<compile_context>
chip_gen: v5e
topology: v5e:2x2
jax: 0.10.0
libtpu: 0.0.40
codegen_flags: <defaults>
</compile_context>

<pallas_src>
import functools

import jax
import jax.numpy as jnp
from jax import lax
from jax.experimental import pallas as pl
from jax.experimental.pallas import tpu as pltpu

_TILE_H = 8          # (TH, W=128) compute plane == exactly one (8,128) f32 vreg
_TILES_PER_STEP = 2  # row-tiles per grid step (amortizes fixed per-step cost)
_UNROLL = 2          # manual unroll of the per-tile point loop


def _raster_compose_kernel(start_ref, niter_ref, px_ref, py_ref, pz_ref,
                           img_ref, zbuf_ref, *, img_h, img_w, tile_h,
                           sub_tiles, radius, kpp, unroll):
    """One grid step = `sub_tiles` row-tiles: rasterize candidates + composite.

    start_ref/niter_ref : SMEM (n_tiles,) int32   per row-tile candidate slice
    px_ref/py_ref/pz_ref: SMEM (P+pad,) float32   y-sorted NDC x, NDC y, view z
    img_ref : VMEM (sub_tiles*TH, W)     composited image (single channel)
    zbuf_ref: VMEM (K, sub_tiles*TH, W)  per-slot z buffer
    """
    r2 = radius * radius
    inv_r2 = 1.0 / r2
    K, TH, W = kpp, tile_h, img_w
    s_min = float(min(img_h, img_w))

    step = pl.program_id(0)

    cols = lax.broadcasted_iota(jnp.int32, (TH, W), 1).astype(jnp.float32)
    rows = lax.broadcasted_iota(jnp.int32, (TH, W), 0).astype(jnp.float32)
    # NDC x of pixel centers (pytorch3d: +x left, +y up); same for all row-tiles.
    xf = (img_w - 1.0 - 2.0 * cols) / s_min

    for sub in range(sub_tiles):
        tile = step * sub_tiles + sub
        row0 = (tile * TH).astype(jnp.float32)
        yf = (img_h - 1.0 - 2.0 * (rows + row0)) / s_min

        start = start_ref[tile]
        n_it = niter_ref[tile]

        # Register-resident slot lists, sorted ascending in z, +inf = empty.
        init_z = tuple(jnp.full((TH, W), jnp.inf, jnp.float32) for _ in range(K))
        init_d = tuple(jnp.zeros((TH, W), jnp.float32) for _ in range(K))

        def insert_point(p, zs, ds, yf=yf):
            # Candidate key per pixel: view z if the point covers the pixel,
            # +inf otherwise. Points behind the camera were culled in the
            # prepass (y sentinel), so no z test is needed in the hot loop.
            px = px_ref[p]
            py = py_ref[p]
            pz = pz_ref[p]
            dx = xf - px
            dy = yf - py
            d2 = dx * dx + dy * dy
            cand_z = jnp.where(d2 < r2, pz, jnp.inf)
            cand_d = d2
            # Compare-exchange ("bubble") insertion into the sorted slot list.
            # Strict '<' preserves stable-tie behavior (existing entry wins).
            new_z, new_d = [], []
            for k in range(K):
                zk = zs[k]
                dk = ds[k]
                m = cand_z < zk
                new_z.append(jnp.where(m, cand_z, zk))
                new_d.append(jnp.where(m, cand_d, dk))
                cand_z = jnp.where(m, zk, cand_z)
                cand_d = jnp.where(m, dk, cand_d)
            return tuple(new_z), tuple(new_d)

        def point_body(i, carry, start=start):
            zs, ds = carry
            p = start + i * unroll
            for u in range(unroll):   # manual unroll: scalar SMEM loads overlap
                zs, ds = insert_point(p + u, zs, ds)
            return (zs, ds)

        zs, ds = lax.fori_loop(0, n_it, point_body, (init_z, init_d))

        # Alpha compositing; features_packed() == ones -> feature gather == 1.0.
        cum = jnp.ones((TH, W), jnp.float32)
        out = jnp.zeros((TH, W), jnp.float32)
        for k in range(K):
            hit = zs[k] < jnp.inf
            a = jnp.where(hit, 1.0 - ds[k] * inv_r2, 0.0)
            out = out + cum * a
            cum = cum * (1.0 - a)

        lo = sub * TH
        hi = lo + TH
        img_ref[lo:hi, :] = out
        for k in range(K):
            zbuf_ref[k, lo:hi, :] = jnp.where(zs[k] < jnp.inf, zs[k], -1.0)


def _project_to_ndc(pcd, K_intr, img_size):
    """world -> pytorch3d NDC (x,y) + view-space z. Pure-JAX glue (per point)."""
    H, W = img_size
    s_min = float(min(H, W))
    fx, fy = K_intr[0, 0], K_intr[1, 1]
    cx, cy = K_intr[0, 2], K_intr[1, 2]
    x, y, z = pcd[:, 0], pcd[:, 1], pcd[:, 2]
    # world -> pytorch3d view: R = diag(-1,-1,1), T = 0 (opencv_to_pytorch3d(eye(4)))
    xv, yv, zv = -x, -y, z
    # view -> screen pixels (in_ndc=False perspective projection)
    xs = fx * xv / zv + cx
    ys = fy * yv / zv + cy
    # screen -> pytorch3d NDC (+x left, +y up); z stays as view-space depth
    xn = (W - 2.0 * xs) / s_min
    yn = (H - 2.0 * ys) / s_min
    return xn.astype(jnp.float32), yn.astype(jnp.float32), zv.astype(jnp.float32)


@functools.partial(jax.jit, static_argnames=("img_size", "radius", "points_per_pixel"))
def pcd_render(pcd, K_intr, img_size=(64, 128), radius=0.005, points_per_pixel=10):
    """Pallas implementation of PCDRender.forward(pcd) -> (images, zbuf)."""
    H, W = img_size
    TH, SUB, UNROLL = _TILE_H, _TILES_PER_STEP, _UNROLL
    assert H % (TH * SUB) == 0 and W % 128 == 0, "demo sizes must tile (8,128)"
    P = pcd.shape[0]
    K = points_per_pixel
    s_min = float(min(H, W))
    n_tiles = H // TH
    n_steps = n_tiles // SUB

    xn, yn, zv = _project_to_ndc(pcd, K_intr, img_size)

    # Cull points behind the camera in the prepass: the y sentinel pushes them
    # past every tile's candidate slice and guarantees d2 > r^2 if ever read,
    # so the kernel's hot loop needs no z test.
    cull = zv < 0.0
    yn = jnp.where(cull, 1e9, yn)
    xn = jnp.where(cull, 0.0, xn)

    # Bin points by row-tile: sort by NDC y so each tile's candidates are a
    # contiguous slice of the sorted arrays (tile y-ranges are monotone in y).
    order = jnp.argsort(yn)
    xs_s, ys_s, zs_s = xn[order], yn[order], zv[order]

    t = jnp.arange(n_tiles, dtype=jnp.float32)
    y_hi = (H - 1.0 - 2.0 * (t * TH)) / s_min                # first row (max y)
    y_lo = (H - 1.0 - 2.0 * ((t + 1.0) * TH - 1.0)) / s_min  # last row (min y)
    starts = jnp.searchsorted(ys_s, y_lo - radius, side="left").astype(jnp.int32)
    ends = jnp.searchsorted(ys_s, y_hi + radius, side="right").astype(jnp.int32)
    counts = ends - starts
    n_iters = (counts + (UNROLL - 1)) // UNROLL              # unrolled trip count

    # The rounded-up trip count may read up to UNROLL-1 points past `ends`;
    # those are either real points with y > y_hi + radius (side='right' margin
    # => dy^2 > r^2) or pad/sentinel points with y = 1e9. Either way they fail
    # d2 < r^2. pad must stay >= UNROLL - 1 (keep pad == UNROLL).
    pad = UNROLL
    xs_p = jnp.concatenate([xs_s, jnp.zeros((pad,), jnp.float32)])
    ys_p = jnp.concatenate([ys_s, jnp.full((pad,), 1e9, jnp.float32)])
    zs_p = jnp.concatenate([zs_s, jnp.full((pad,), -1.0, jnp.float32)])

    kernel = functools.partial(
        _raster_compose_kernel, img_h=H, img_w=W, tile_h=TH, sub_tiles=SUB,
        radius=float(radius), kpp=K, unroll=UNROLL)

    # TODO(synk): for very large point clouds (P >~ 64K), scalar-prefetch the
    # point arrays or DMA each tile's candidate slice HBM->SMEM (double-
    # buffered via make_async_copy) instead of whole-array SMEM residency.
    # TODO(synk): v7x megacore balance for y-concentrated clouds: permute the
    # block->step assignment via a prefetched perm array (prefetch-dependent
    # out index_map); unnecessary for roughly uniform clouds.
    img_hw, zbuf_khw = pl.pallas_call(
        kernel,
        out_shape=(jax.ShapeDtypeStruct((H, W), jnp.float32),
                   jax.ShapeDtypeStruct((K, H, W), jnp.float32)),
        grid_spec=pltpu.PrefetchScalarGridSpec(
            num_scalar_prefetch=2,
            grid=(n_steps,),
            in_specs=[pl.BlockSpec(memory_space=pltpu.MemorySpace.SMEM),
                      pl.BlockSpec(memory_space=pltpu.MemorySpace.SMEM),
                      pl.BlockSpec(memory_space=pltpu.MemorySpace.SMEM)],
            out_specs=(pl.BlockSpec((SUB * TH, W), lambda i, s, n: (i, 0)),
                       pl.BlockSpec((K, SUB * TH, W), lambda i, s, n: (0, i, 0)))),
        compiler_params=pltpu.CompilerParams(
            dimension_semantics=("parallel",)),
    )(starts, n_iters, xs_p, ys_p, zs_p)

    images = jnp.broadcast_to(img_hw[None, :, :, None], (1, H, W, 3))  # NHWC
    zbuf = jnp.transpose(zbuf_khw, (1, 2, 0))[None]                    # (1,H,W,K)
    return images, zbuf


def pcd_render_reference(pcd, K_intr, img_size, radius=0.005, points_per_pixel=10):
    """Pure-JAX reference of the same semantics (for correctness check)."""
    H, W = img_size
    s_min = float(min(H, W))
    r2 = float(radius) * float(radius)
    xn, yn, zv = _project_to_ndc(pcd, K_intr, img_size)

    cols = jnp.arange(W, dtype=jnp.float32)
    rows = jnp.arange(H, dtype=jnp.float32)
    xf = (W - 1.0 - 2.0 * cols) / s_min            # (W,)
    yf = (H - 1.0 - 2.0 * rows) / s_min            # (H,)
    dx = xf[None, :, None] - xn[None, None, :]     # (1, W, P)
    dy = yf[:, None, None] - yn[None, None, :]     # (H, 1, P)
    d2 = dx * dx + dy * dy                         # (H, W, P)
    valid = jnp.logical_and(zv[None, None, :] >= 0.0, d2 < r2)
    key = jnp.where(valid, zv[None, None, :], jnp.inf)
    order = jnp.argsort(key, axis=-1)[..., :points_per_pixel]  # stable
    key_s = jnp.take_along_axis(key, order, axis=-1)
    hit = jnp.isfinite(key_s)
    zbuf = jnp.where(hit, key_s, -1.0)
    d2_s = jnp.take_along_axis(d2, order, axis=-1)
    w = jnp.where(hit, 1.0 - d2_s / r2, 0.0)

    cum = jnp.ones((H, W), jnp.float32)
    out = jnp.zeros((H, W), jnp.float32)
    for k in range(points_per_pixel):
        a = w[..., k]
        out = out + cum * a
        cum = cum * (1.0 - a)
    images = jnp.broadcast_to(out[..., None], (H, W, 3))[None]
    return images, zbuf[None]


if __name__ == "__main__":
    key = jax.random.PRNGKey(0)
    H, W, P = 64, 128, 2048         # small demo image / point count
    KPP = 10                        # points_per_pixel (module setting)
    RADIUS = 0.005                  # NDC radius (module setting)

    # deterministic intrinsics for the small image
    K_intr = jnp.array([[60.0, 0.0, W / 2.0],
                        [0.0, 60.0, H / 2.0],
                        [0.0, 0.0, 1.0]], dtype=jnp.float32)

    k1, k2 = jax.random.split(key)
    xy = jax.random.uniform(k1, (P, 2), minval=-0.5, maxval=0.5)
    z = jax.random.uniform(k2, (P, 1), minval=1.5, maxval=2.5)
    pcd = jnp.concatenate([xy, z], axis=1).astype(jnp.float32)

    images, zbuf = pcd_render(pcd, K_intr, img_size=(H, W),
                              radius=RADIUS, points_per_pixel=KPP)
    jax.block_until_ready((images, zbuf))

    ref_images, ref_zbuf = pcd_render_reference(pcd, K_intr, (H, W),
                                                radius=RADIUS,
                                                points_per_pixel=KPP)
    assert images.shape == (1, H, W, 3) and zbuf.shape == (1, H, W, KPP)
    assert bool(jnp.all(jnp.isfinite(images))) and bool(jnp.all(jnp.isfinite(zbuf)))
    assert bool(jnp.allclose(images, ref_images, atol=1e-5, rtol=1e-5))
    assert bool(jnp.allclose(zbuf, ref_zbuf, atol=1e-5, rtol=1e-5))
    print("KERNEL_OK")
</pallas_src>

<mosaic_0001>
module attributes {stable_mosaic.version = 11 : i64} {
  func.func @_raster_compose_kernel(%arg0: i32, %arg1: memref<8xi32, #tpu.memory_space<smem>>, %arg2: memref<8xi32, #tpu.memory_space<smem>>, %arg3: memref<2050xf32, #tpu.memory_space<smem>>, %arg4: memref<2050xf32, #tpu.memory_space<smem>>, %arg5: memref<2050xf32, #tpu.memory_space<smem>>, %arg6: memref<16x128xf32, #tpu.memory_space<vmem>>, %arg7: memref<10x16x128xf32, #tpu.memory_space<vmem>>) attributes {dimension_semantics = [#tpu.dimension_semantics<parallel>], iteration_bounds = array<i64: 4>, scalar_prefetch = 2 : i64, scratch_operands = 0 : i64, tpu.core_type = #tpu.core_type<tc>, window_params = [{transform_indices = @transform_0, window_bounds = array<i64: 2050>}, {transform_indices = @transform_1, window_bounds = array<i64: 2050>}, {transform_indices = @transform_2, window_bounds = array<i64: 2050>}, {transform_indices = @transform_3, window_bounds = array<i64: 16, 128>}, {transform_indices = @transform_4, window_bounds = array<i64: 10, 16, 128>}]} {
    %0 = tpu.iota {dimensions = array<i32: 1>} : vector<8x128xi32>
    %1 = arith.sitofp %0 : vector<8x128xi32> to vector<8x128xf32>
    %2 = tpu.iota {dimensions = array<i32: 0>} : vector<8x128xi32>
    %3 = arith.sitofp %2 : vector<8x128xi32> to vector<8x128xf32>
    %cst = arith.constant 2.000000e+00 : f32
    %4 = vector.broadcast %cst : f32 to vector<8x128xf32>
    %5 = arith.mulf %4, %1 : vector<8x128xf32>
    %cst_0 = arith.constant 1.270000e+02 : f32
    %6 = vector.broadcast %cst_0 : f32 to vector<8x128xf32>
    %7 = arith.subf %6, %5 : vector<8x128xf32>
    %cst_1 = arith.constant 6.400000e+01 : f32
    %8 = vector.broadcast %cst_1 : f32 to vector<8x128xf32>
    %9 = arith.divf %7, %8 : vector<8x128xf32>
    %c2_i32 = arith.constant 2 : i32
    %10 = arith.muli %arg0, %c2_i32 : i32
    %c0_i32 = arith.constant 0 : i32
    %11 = arith.addi %10, %c0_i32 : i32
    %c8_i32 = arith.constant 8 : i32
    %12 = arith.muli %11, %c8_i32 : i32
    %13 = arith.sitofp %12 : i32 to f32
    %14 = vector.broadcast %13 : f32 to vector<8x128xf32>
    %15 = arith.addf %3, %14 : vector<8x128xf32>
    %cst_2 = arith.constant 2.000000e+00 : f32
    %16 = vector.broadcast %cst_2 : f32 to vector<8x128xf32>
    %17 = arith.mulf %16, %15 : vector<8x128xf32>
    %cst_3 = arith.constant 6.300000e+01 : f32
    %18 = vector.broadcast %cst_3 : f32 to vector<8x128xf32>
    %19 = arith.subf %18, %17 : vector<8x128xf32>
    %cst_4 = arith.constant 6.400000e+01 : f32
    %20 = vector.broadcast %cst_4 : f32 to vector<8x128xf32>
    %21 = arith.divf %19, %20 : vector<8x128xf32>
    %22 = arith.index_cast %11 : i32 to index
    %23 = memref.load %arg1[%22] : memref<8xi32, #tpu.memory_space<smem>>
    %24 = arith.index_cast %11 : i32 to index
    %25 = memref.load %arg2[%24] : memref<8xi32, #tpu.memory_space<smem>>
    %cst_5 = arith.constant 0x7F800000 : f32
    %26 = vector.broadcast %cst_5 : f32 to vector<8x128xf32>
    %cst_6 = arith.constant 0x7F800000 : f32
    %27 = vector.broadcast %cst_6 : f32 to vector<8x128xf32>
    %cst_7 = arith.constant 0x7F800000 : f32
    %28 = vector.broadcast %cst_7 : f32 to vector<8x128xf32>
    %cst_8 = arith.constant 0x7F800000 : f32
    %29 = vector.broadcast %cst_8 : f32 to vector<8x128xf32>
    %cst_9 = arith.constant 0x7F800000 : f32
    %30 = vector.broadcast %cst_9 : f32 to vector<8x128xf32>
    %cst_10 = arith.constant 0x7F800000 : f32
    %31 = vector.broadcast %cst_10 : f32 to vector<8x128xf32>
    %cst_11 = arith.constant 0x7F800000 : f32
    %32 = vector.broadcast %cst_11 : f32 to vector<8x128xf32>
    %cst_12 = arith.constant 0x7F800000 : f32
    %33 = vector.broadcast %cst_12 : f32 to vector<8x128xf32>
    %cst_13 = arith.constant 0x7F800000 : f32
    %34 = vector.broadcast %cst_13 : f32 to vector<8x128xf32>
    %cst_14 = arith.constant 0x7F800000 : f32
    %35 = vector.broadcast %cst_14 : f32 to vector<8x128xf32>
    %cst_15 = arith.constant 0.000000e+00 : f32
    %36 = vector.broadcast %cst_15 : f32 to vector<8x128xf32>
    %cst_16 = arith.constant 0.000000e+00 : f32
    %37 = vector.broadcast %cst_16 : f32 to vector<8x128xf32>
    %cst_17 = arith.constant 0.000000e+00 : f32
    %38 = vector.broadcast %cst_17 : f32 to vector<8x128xf32>
    %cst_18 = arith.constant 0.000000e+00 : f32
    %39 = vector.broadcast %cst_18 : f32 to vector<8x128xf32>
    %cst_19 = arith.constant 0.000000e+00 : f32
    %40 = vector.broadcast %cst_19 : f32 to vector<8x128xf32>
    %cst_20 = arith.constant 0.000000e+00 : f32
    %41 = vector.broadcast %cst_20 : f32 to vector<8x128xf32>
    %cst_21 = arith.constant 0.000000e+00 : f32
    %42 = vector.broadcast %cst_21 : f32 to vector<8x128xf32>
    %cst_22 = arith.constant 0.000000e+00 : f32
    %43 = vector.broadcast %cst_22 : f32 to vector<8x128xf32>
    %cst_23 = arith.constant 0.000000e+00 : f32
    %44 = vector.broadcast %cst_23 : f32 to vector<8x128xf32>
    %cst_24 = arith.constant 0.000000e+00 : f32
    %45 = vector.broadcast %cst_24 : f32 to vector<8x128xf32>
    %c0_i32_25 = arith.constant 0 : i32
    %46 = arith.subi %25, %c0_i32_25 : i32
    %47 = arith.addi %c0_i32_25, %46 : i32
    %c1_i32 = arith.constant 1 : i32
    %48:20 = scf.for %arg8 = %c0_i32_25 to %47 step %c1_i32 iter_args(%arg9 = %26, %arg10 = %27, %arg11 = %28, %arg12 = %29, %arg13 = %30, %arg14 = %31, %arg15 = %32, %arg16 = %33, %arg17 = %34, %arg18 = %35, %arg19 = %36, %arg20 = %37, %arg21 = %38, %arg22 = %39, %arg23 = %40, %arg24 = %41, %arg25 = %42, %arg26 = %43, %arg27 = %44, %arg28 = %45) -> (vector<8x128xf32>, vector<8x128xf32>, vector<8x128xf32>, vector<8x128xf32>, vector<8x128xf32>, vector<8x128xf32>, vector<8x128xf32>, vector<8x128xf32>, vector<8x128xf32>, vector<8x128xf32>, vector<8x128xf32>, vector<8x128xf32>, vector<8x128xf32>, vector<8x128xf32>, vector<8x128xf32>, vector<8x128xf32>, vector<8x128xf32>, vector<8x128xf32>, vector<8x128xf32>, vector<8x128xf32>)  : i32 {
      %c2_i32_250 = arith.constant 2 : i32
      %488 = arith.muli %arg8, %c2_i32_250 : i32
      %489 = arith.addi %23, %488 : i32
      %c0_i32_251 = arith.constant 0 : i32
      %490 = arith.addi %489, %c0_i32_251 : i32
      %491 = arith.index_cast %490 : i32 to index
      %492 = memref.load %arg3[%491] : memref<2050xf32, #tpu.memory_space<smem>>
      %493 = arith.index_cast %490 : i32 to index
      %494 = memref.load %arg4[%493] : memref<2050xf32, #tpu.memory_space<smem>>
      %495 = arith.index_cast %490 : i32 to index
      %496 = memref.load %arg5[%495] : memref<2050xf32, #tpu.memory_space<smem>>
      %497 = vector.broadcast %492 : f32 to vector<8x128xf32>
      %498 = arith.subf %9, %497 : vector<8x128xf32>
      %499 = vector.broadcast %494 : f32 to vector<8x128xf32>
      %500 = arith.subf %21, %499 : vector<8x128xf32>
      %501 = arith.mulf %498, %498 : vector<8x128xf32>
      %502 = arith.mulf %500, %500 : vector<8x128xf32>
      %503 = arith.addf %501, %502 : vector<8x128xf32>
      %cst_252 = arith.constant 2.500000e-05 : f32
      %504 = vector.broadcast %cst_252 : f32 to vector<8x128xf32>
      %505 = arith.cmpf olt, %503, %504 : vector<8x128xf32>
      %cst_253 = arith.constant 0x7F800000 : f32
      %506 = vector.broadcast %496 : f32 to vector<8x128xf32>
      %507 = vector.broadcast %cst_253 : f32 to vector<8x128xf32>
      %508 = arith.select %505, %506, %507 : vector<8x128xi1>, vector<8x128xf32>
      %509 = arith.cmpf olt, %508, %arg9 : vector<8x128xf32>
      %510 = arith.select %509, %508, %arg9 : vector<8x128xi1>, vector<8x128xf32>
      %511 = arith.select %509, %503, %arg19 : vector<8x128xi1>, vector<8x128xf32>
      %512 = arith.select %509, %arg9, %508 : vector<8x128xi1>, vector<8x128xf32>
      %513 = arith.select %509, %arg19, %503 : vector<8x128xi1>, vector<8x128xf32>
      %514 = arith.cmpf olt, %512, %arg10 : vector<8x128xf32>
      %515 = arith.select %514, %512, %arg10 : vector<8x128xi1>, vector<8x128xf32>
      %516 = arith.select %514, %513, %arg20 : vector<8x128xi1>, vector<8x128xf32>
      %517 = arith.select %514, %arg10, %512 : vector<8x128xi1>, vector<8x128xf32>
      %518 = arith.select %514, %arg20, %513 : vector<8x128xi1>, vector<8x128xf32>
      %519 = arith.cmpf olt, %517, %arg11 : vector<8x128xf32>
      %520 = arith.select %519, %517, %arg11 : vector<8x128xi1>, vector<8x128xf32>
      %521 = arith.select %519, %518, %arg21 : vector<8x128xi1>, vector<8x128xf32>
      %522 = arith.select %519, %arg11, %517 : vector<8x128xi1>, vector<8x128xf32>
      %523 = arith.select %519, %arg21, %518 : vector<8x128xi1>, vector<8x128xf32>
      %524 = arith.cmpf olt, %522, %arg12 : vector<8x128xf32>
      %525 = arith.select %524, %522, %arg12 : vector<8x128xi1>, vector<8x128xf32>
      %526 = arith.select %524, %523, %arg22 : vector<8x128xi1>, vector<8x128xf32>
      %527 = arith.select %524, %arg12, %522 : vector<8x128xi1>, vector<8x128xf32>
      %528 = arith.select %524, %arg22, %523 : vector<8x128xi1>, vector<8x128xf32>
      %529 = arith.cmpf olt, %527, %arg13 : vector<8x128xf32>
      %530 = arith.select %529, %527, %arg13 : vector<8x128xi1>, vector<8x128xf32>
      %531 = arith.select %529, %528, %arg23 : vector<8x128xi1>, vector<8x128xf32>
      %532 = arith.select %529, %arg13, %527 : vector<8x128xi1>, vector<8x128xf32>
      %533 = arith.select %529, %arg23, %528 : vector<8x128xi1>, vector<8x128xf32>
      %534 = arith.cmpf olt, %532, %arg14 : vector<8x128xf32>
      %535 = arith.select %534, %532, %arg14 : vector<8x128xi1>, vector<8x128xf32>
      %536 = arith.select %534, %533, %arg24 : vector<8x128xi1>, vector<8x128xf32>
      %537 = arith.select %534, %arg14, %532 : vector<8x128xi1>, vector<8x128xf32>
      %538 = arith.select %534, %arg24, %533 : vector<8x128xi1>, vector<8x128xf32>
      %539 = arith.cmpf olt, %537, %arg15 : vector<8x128xf32>
      %540 = arith.select %539, %537, %arg15 : vector<8x128xi1>, vector<8x128xf32>
      %541 = arith.select %539, %538, %arg25 : vector<8x128xi1>, vector<8x128xf32>
      %542 = arith.select %539, %arg15, %537 : vector<8x128xi1>, vector<8x128xf32>
      %543 = arith.select %539, %arg25, %538 : vector<8x128xi1>, vector<8x128xf32>
      %544 = arith.cmpf olt, %542, %arg16 : vector<8x128xf32>
      %545 = arith.select %544, %542, %arg16 : vector<8x128xi1>, vector<8x128xf32>
      %546 = arith.select %544, %543, %arg26 : vector<8x128xi1>, vector<8x128xf32>
      %547 = arith.select %544, %arg16, %542 : vector<8x128xi1>, vector<8x128xf32>
      %548 = arith.select %544, %arg26, %543 : vector<8x128xi1>, vector<8x128xf32>
      %549 = arith.cmpf olt, %547, %arg17 : vector<8x128xf32>
      %550 = arith.select %549, %547, %arg17 : vector<8x128xi1>, vector<8x128xf32>
      %551 = arith.select %549, %548, %arg27 : vector<8x128xi1>, vector<8x128xf32>
      %552 = arith.select %549, %arg17, %547 : vector<8x128xi1>, vector<8x128xf32>
      %553 = arith.select %549, %arg27, %548 : vector<8x128xi1>, vector<8x128xf32>
      %554 = arith.cmpf olt, %552, %arg18 : vector<8x128xf32>
      %555 = arith.select %554, %552, %arg18 : vector<8x128xi1>, vector<8x128xf32>
      %556 = arith.select %554, %553, %arg28 : vector<8x128xi1>, vector<8x128xf32>
      %557 = arith.select %554, %arg18, %552 : vector<8x128xi1>, vector<8x128xf32>
      %558 = arith.select %554, %arg28, %553 : vector<8x128xi1>, vector<8x128xf32>
      %c1_i32_254 = arith.constant 1 : i32
      %559 = arith.addi %489, %c1_i32_254 : i32
      %560 = arith.index_cast %559 : i32 to index
      %561 = memref.load %arg3[%560] : memref<2050xf32, #tpu.memory_space<smem>>
      %562 = arith.index_cast %559 : i32 to index
      %563 = memref.load %arg4[%562] : memref<2050xf32, #tpu.memory_space<smem>>
      %564 = arith.index_cast %559 : i32 to index
      %565 = memref.load %arg5[%564] : memref<2050xf32, #tpu.memory_space<smem>>
      %566 = vector.broadcast %561 : f32 to vector<8x128xf32>
      %567 = arith.subf %9, %566 : vector<8x128xf32>
      %568 = vector.broadcast %563 : f32 to vector<8x128xf32>
      %569 = arith.subf %21, %568 : vector<8x128xf32>
      %570 = arith.mulf %567, %567 : vector<8x128xf32>
      %571 = arith.mulf %569, %569 : vector<8x128xf32>
      %572 = arith.addf %570, %571 : vector<8x128xf32>
      %cst_255 = arith.constant 2.500000e-05 : f32
      %573 = vector.broadcast %cst_255 : f32 to vector<8x128xf32>
      %574 = arith.cmpf olt, %572, %573 : vector<8x128xf32>
      %cst_256 = arith.constant 0x7F800000 : f32
      %575 = vector.broadcast %565 : f32 to vector<8x128xf32>
      %576 = vector.broadcast %cst_256 : f32 to vector<8x128xf32>
      %577 = arith.select %574, %575, %576 : vector<8x128xi1>, vector<8x128xf32>
      %578 = arith.cmpf olt, %577, %510 : vector<8x128xf32>
      %579 = arith.select %578, %577, %510 : vector<8x128xi1>, vector<8x128xf32>
      %580 = arith.select %578, %572, %511 : vector<8x128xi1>, vector<8x128xf32>
      %581 = arith.select %578, %510, %577 : vector<8x128xi1>, vector<8x128xf32>
      %582 = arith.select %578, %511, %572 : vector<8x128xi1>, vector<8x128xf32>
      %583 = arith.cmpf olt, %581, %515 : vector<8x128xf32>
      %584 = arith.select %583, %581, %515 : vector<8x128xi1>, vector<8x128xf32>
      %585 = arith.select %583, %582, %516 : vector<8x128xi1>, vector<8x128xf32>
      %586 = arith.select %583, %515, %581 : vector<8x128xi1>, vector<8x128xf32>
      %587 = arith.select %583, %516, %582 : vector<8x128xi1>, vector<8x128xf32>
      %588 = arith.cmpf olt, %586, %520 : vector<8x128xf32>
      %589 = arith.select %588, %586, %520 : vector<8x128xi1>, vector<8x128xf32>
      %590 = arith.select %588, %587, %521 : vector<8x128xi1>, vector<8x128xf32>
      %591 = arith.select %588, %520, %586 : vector<8x128xi1>, vector<8x128xf32>
      %592 = arith.select %588, %521, %587 : vector<8x128xi1>, vector<8x128xf32>
      %593 = arith.cmpf olt, %591, %525 : vector<8x128xf32>
      %594 = arith.select %593, %591, %525 : vector<8x128xi1>, vector<8x128xf32>
      %595 = arith.select %593, %592, %526 : vector<8x128xi1>, vector<8x128xf32>
      %596 = arith.select %593, %525, %591 : vector<8x128xi1>, vector<8x128xf32>
      %597 = arith.select %593, %526, %592 : vector<8x128xi1>, vector<8x128xf32>
      %598 = arith.cmpf olt, %596, %530 : vector<8x128xf32>
      %599 = arith.select %598, %596, %530 : vector<8x128xi1>, vector<8x128xf32>
      %600 = arith.select %598, %597, %531 : vector<8x128xi1>, vector<8x128xf32>
      %601 = arith.select %598, %530, %596 : vector<8x128xi1>, vector<8x128xf32>
      %602 = arith.select %598, %531, %597 : vector<8x128xi1>, vector<8x128xf32>
      %603 = arith.cmpf olt, %601, %535 : vector<8x128xf32>
      %604 = arith.select %603, %601, %535 : vector<8x128xi1>, vector<8x128xf32>
      %605 = arith.select %603, %602, %536 : vector<8x128xi1>, vector<8x128xf32>
      %606 = arith.select %603, %535, %601 : vector<8x128xi1>, vector<8x128xf32>
      %607 = arith.select %603, %536, %602 : vector<8x128xi1>, vector<8x128xf32>
      %608 = arith.cmpf olt, %606, %540 : vector<8x128xf32>
      %609 = arith.select %608, %606, %540 : vector<8x128xi1>, vector<8x128xf32>
      %610 = arith.select %608, %607, %541 : vector<8x128xi1>, vector<8x128xf32>
      %611 = arith.select %608, %540, %606 : vector<8x128xi1>, vector<8x128xf32>
      %612 = arith.select %608, %541, %607 : vector<8x128xi1>, vector<8x128xf32>
      %613 = arith.cmpf olt, %611, %545 : vector<8x128xf32>
      %614 = arith.select %613, %611, %545 : vector<8x128xi1>, vector<8x128xf32>
      %615 = arith.select %613, %612, %546 : vector<8x128xi1>, vector<8x128xf32>
      %616 = arith.select %613, %545, %611 : vector<8x128xi1>, vector<8x128xf32>
      %617 = arith.select %613, %546, %612 : vector<8x128xi1>, vector<8x128xf32>
      %618 = arith.cmpf olt, %616, %550 : vector<8x128xf32>
      %619 = arith.select %618, %616, %550 : vector<8x128xi1>, vector<8x128xf32>
      %620 = arith.select %618, %617, %551 : vector<8x128xi1>, vector<8x128xf32>
      %621 = arith.select %618, %550, %616 : vector<8x128xi1>, vector<8x128xf32>
      %622 = arith.select %618, %551, %617 : vector<8x128xi1>, vector<8x128xf32>
      %623 = arith.cmpf olt, %621, %555 : vector<8x128xf32>
      %624 = arith.select %623, %621, %555 : vector<8x128xi1>, vector<8x128xf32>
      %625 = arith.select %623, %622, %556 : vector<8x128xi1>, vector<8x128xf32>
      %626 = arith.select %623, %555, %621 : vector<8x128xi1>, vector<8x128xf32>
      %627 = arith.select %623, %556, %622 : vector<8x128xi1>, vector<8x128xf32>
      scf.yield %579, %584, %589, %594, %599, %604, %609, %614, %619, %624, %580, %585, %590, %595, %600, %605, %610, %615, %620, %625 : vector<8x128xf32>, vector<8x128xf32>, vector<8x128xf32>, vector<8x128xf32>, vector<8x128xf32>, vector<8x128xf32>, vector<8x128xf32>, vector<8x128xf32>, vector<8x128xf32>, vector<8x128xf32>, vector<8x128xf32>, vector<8x128xf32>, vector<8x128xf32>, vector<8x128xf32>, vector<8x128xf32>, vector<8x128xf32>, vector<8x128xf32>, vector<8x128xf32>, vector<8x128xf32>, vector<8x128xf32>
    }
    %cst_26 = arith.constant 1.000000e+00 : f32
    %49 = vector.broadcast %cst_26 : f32 to vector<8x128xf32>
    %cst_27 = arith.constant 0.000000e+00 : f32
    %50 = vector.broadcast %cst_27 : f32 to vector<8x128xf32>
    %cst_28 = arith.constant 0x7F800000 : f32
    %51 = vector.broadcast %cst_28 : f32 to vector<8x128xf32>
    %52 = arith.cmpf olt, %48#0, %51 : vector<8x128xf32>
    %cst_29 = arith.constant 4.000000e+04 : f32
    %53 = vector.broadcast %cst_29 : f32 to vector<8x128xf32>
    %54 = arith.mulf %48#10, %53 : vector<8x128xf32>
    %cst_30 = arith.constant 1.000000e+00 : f32
    %55 = vector.broadcast %cst_30 : f32 to vector<8x128xf32>
    %56 = arith.subf %55, %54 : vector<8x128xf32>
    %cst_31 = arith.constant 0.000000e+00 : f32
    %57 = vector.broadcast %cst_31 : f32 to vector<8x128xf32>
    %58 = arith.select %52, %56, %57 : vector<8x128xi1>, vector<8x128xf32>
    %59 = arith.mulf %49, %58 : vector<8x128xf32>
    %60 = arith.addf %50, %59 : vector<8x128xf32>
    %cst_32 = arith.constant 1.000000e+00 : f32
    %61 = vector.broadcast %cst_32 : f32 to vector<8x128xf32>
    %62 = arith.subf %61, %58 : vector<8x128xf32>
    %63 = arith.mulf %49, %62 : vector<8x128xf32>
    %cst_33 = arith.constant 0x7F800000 : f32
    %64 = vector.broadcast %cst_33 : f32 to vector<8x128xf32>
    %65 = arith.cmpf olt, %48#1, %64 : vector<8x128xf32>
    %cst_34 = arith.constant 4.000000e+04 : f32
    %66 = vector.broadcast %cst_34 : f32 to vector<8x128xf32>
    %67 = arith.mulf %48#11, %66 : vector<8x128xf32>
    %cst_35 = arith.constant 1.000000e+00 : f32
    %68 = vector.broadcast %cst_35 : f32 to vector<8x128xf32>
    %69 = arith.subf %68, %67 : vector<8x128xf32>
    %cst_36 = arith.constant 0.000000e+00 : f32
    %70 = vector.broadcast %cst_36 : f32 to vector<8x128xf32>
    %71 = arith.select %65, %69, %70 : vector<8x128xi1>, vector<8x128xf32>
    %72 = arith.mulf %63, %71 : vector<8x128xf32>
    %73 = arith.addf %60, %72 : vector<8x128xf32>
    %cst_37 = arith.constant 1.000000e+00 : f32
    %74 = vector.broadcast %cst_37 : f32 to vector<8x128xf32>
    %75 = arith.subf %74, %71 : vector<8x128xf32>
    %76 = arith.mulf %63, %75 : vector<8x128xf32>
    %cst_38 = arith.constant 0x7F800000 : f32
    %77 = vector.broadcast %cst_38 : f32 to vector<8x128xf32>
    %78 = arith.cmpf olt, %48#2, %77 : vector<8x128xf32>
    %cst_39 = arith.constant 4.000000e+04 : f32
    %79 = vector.broadcast %cst_39 : f32 to vector<8x128xf32>
    %80 = arith.mulf %48#12, %79 : vector<8x128xf32>
    %cst_40 = arith.constant 1.000000e+00 : f32
    %81 = vector.broadcast %cst_40 : f32 to vector<8x128xf32>
    %82 = arith.subf %81, %80 : vector<8x128xf32>
    %cst_41 = arith.constant 0.000000e+00 : f32
    %83 = vector.broadcast %cst_41 : f32 to vector<8x128xf32>
    %84 = arith.select %78, %82, %83 : vector<8x128xi1>, vector<8x128xf32>
    %85 = arith.mulf %76, %84 : vector<8x128xf32>
    %86 = arith.addf %73, %85 : vector<8x128xf32>
    %cst_42 = arith.constant 1.000000e+00 : f32
    %87 = vector.broadcast %cst_42 : f32 to vector<8x128xf32>
    %88 = arith.subf %87, %84 : vector<8x128xf32>
    %89 = arith.mulf %76, %88 : vector<8x128xf32>
    %cst_43 = arith.constant 0x7F800000 : f32
    %90 = vector.broadcast %cst_43 : f32 to vector<8x128xf32>
    %91 = arith.cmpf olt, %48#3, %90 : vector<8x128xf32>
    %cst_44 = arith.constant 4.000000e+04 : f32
    %92 = vector.broadcast %cst_44 : f32 to vector<8x128xf32>
    %93 = arith.mulf %48#13, %92 : vector<8x128xf32>
    %cst_45 = arith.constant 1.000000e+00 : f32
    %94 = vector.broadcast %cst_45 : f32 to vector<8x128xf32>
    %95 = arith.subf %94, %93 : vector<8x128xf32>
    %cst_46 = arith.constant 0.000000e+00 : f32
    %96 = vector.broadcast %cst_46 : f32 to vector<8x128xf32>
    %97 = arith.select %91, %95, %96 : vector<8x128xi1>, vector<8x128xf32>
    %98 = arith.mulf %89, %97 : vector<8x128xf32>
    %99 = arith.addf %86, %98 : vector<8x128xf32>
    %cst_47 = arith.constant 1.000000e+00 : f32
    %100 = vector.broadcast %cst_47 : f32 to vector<8x128xf32>
    %101 = arith.subf %100, %97 : vector<8x128xf32>
    %102 = arith.mulf %89, %101 : vector<8x128xf32>
    %cst_48 = arith.constant 0x7F800000 : f32
    %103 = vector.broadcast %cst_48 : f32 to vector<8x128xf32>
    %104 = arith.cmpf olt, %48#4, %103 : vector<8x128xf32>
    %cst_49 = arith.constant 4.000000e+04 : f32
    %105 = vector.broadcast %cst_49 : f32 to vector<8x128xf32>
    %106 = arith.mulf %48#14, %105 : vector<8x128xf32>
    %cst_50 = arith.constant 1.000000e+00 : f32
    %107 = vector.broadcast %cst_50 : f32 to vector<8x128xf32>
    %108 = arith.subf %107, %106 : vector<8x128xf32>
    %cst_51 = arith.constant 0.000000e+00 : f32
    %109 = vector.broadcast %cst_51 : f32 to vector<8x128xf32>
    %110 = arith.select %104, %108, %109 : vector<8x128xi1>, vector<8x128xf32>
    %111 = arith.mulf %102, %110 : vector<8x128xf32>
    %112 = arith.addf %99, %111 : vector<8x128xf32>
    %cst_52 = arith.constant 1.000000e+00 : f32
    %113 = vector.broadcast %cst_52 : f32 to vector<8x128xf32>
    %114 = arith.subf %113, %110 : vector<8x128xf32>
    %115 = arith.mulf %102, %114 : vector<8x128xf32>
    %cst_53 = arith.constant 0x7F800000 : f32
    %116 = vector.broadcast %cst_53 : f32 to vector<8x128xf32>
    %117 = arith.cmpf olt, %48#5, %116 : vector<8x128xf32>
    %cst_54 = arith.constant 4.000000e+04 : f32
    %118 = vector.broadcast %cst_54 : f32 to vector<8x128xf32>
    %119 = arith.mulf %48#15, %118 : vector<8x128xf32>
    %cst_55 = arith.constant 1.000000e+00 : f32
    %120 = vector.broadcast %cst_55 : f32 to vector<8x128xf32>
    %121 = arith.subf %120, %119 : vector<8x128xf32>
    %cst_56 = arith.constant 0.000000e+00 : f32
    %122 = vector.broadcast %cst_56 : f32 to vector<8x128xf32>
    %123 = arith.select %117, %121, %122 : vector<8x128xi1>, vector<8x128xf32>
    %124 = arith.mulf %115, %123 : vector<8x128xf32>
    %125 = arith.addf %112, %124 : vector<8x128xf32>
    %cst_57 = arith.constant 1.000000e+00 : f32
    %126 = vector.broadcast %cst_57 : f32 to vector<8x128xf32>
    %127 = arith.subf %126, %123 : vector<8x128xf32>
    %128 = arith.mulf %115, %127 : vector<8x128xf32>
    %cst_58 = arith.constant 0x7F800000 : f32
    %129 = vector.broadcast %cst_58 : f32 to vector<8x128xf32>
    %130 = arith.cmpf olt, %48#6, %129 : vector<8x128xf32>
    %cst_59 = arith.constant 4.000000e+04 : f32
    %131 = vector.broadcast %cst_59 : f32 to vector<8x128xf32>
    %132 = arith.mulf %48#16, %131 : vector<8x128xf32>
    %cst_60 = arith.constant 1.000000e+00 : f32
    %133 = vector.broadcast %cst_60 : f32 to vector<8x128xf32>
    %134 = arith.subf %133, %132 : vector<8x128xf32>
    %cst_61 = arith.constant 0.000000e+00 : f32
    %135 = vector.broadcast %cst_61 : f32 to vector<8x128xf32>
    %136 = arith.select %130, %134, %135 : vector<8x128xi1>, vector<8x128xf32>
    %137 = arith.mulf %128, %136 : vector<8x128xf32>
    %138 = arith.addf %125, %137 : vector<8x128xf32>
    %cst_62 = arith.constant 1.000000e+00 : f32
    %139 = vector.broadcast %cst_62 : f32 to vector<8x128xf32>
    %140 = arith.subf %139, %136 : vector<8x128xf32>
    %141 = arith.mulf %128, %140 : vector<8x128xf32>
    %cst_63 = arith.constant 0x7F800000 : f32
    %142 = vector.broadcast %cst_63 : f32 to vector<8x128xf32>
    %143 = arith.cmpf olt, %48#7, %142 : vector<8x128xf32>
    %cst_64 = arith.constant 4.000000e+04 : f32
    %144 = vector.broadcast %cst_64 : f32 to vector<8x128xf32>
    %145 = arith.mulf %48#17, %144 : vector<8x128xf32>
    %cst_65 = arith.constant 1.000000e+00 : f32
    %146 = vector.broadcast %cst_65 : f32 to vector<8x128xf32>
    %147 = arith.subf %146, %145 : vector<8x128xf32>
    %cst_66 = arith.constant 0.000000e+00 : f32
    %148 = vector.broadcast %cst_66 : f32 to vector<8x128xf32>
    %149 = arith.select %143, %147, %148 : vector<8x128xi1>, vector<8x128xf32>
    %150 = arith.mulf %141, %149 : vector<8x128xf32>
    %151 = arith.addf %138, %150 : vector<8x128xf32>
    %cst_67 = arith.constant 1.000000e+00 : f32
    %152 = vector.broadcast %cst_67 : f32 to vector<8x128xf32>
    %153 = arith.subf %152, %149 : vector<8x128xf32>
    %154 = arith.mulf %141, %153 : vector<8x128xf32>
    %cst_68 = arith.constant 0x7F800000 : f32
    %155 = vector.broadcast %cst_68 : f32 to vector<8x128xf32>
    %156 = arith.cmpf olt, %48#8, %155 : vector<8x128xf32>
    %cst_69 = arith.constant 4.000000e+04 : f32
    %157 = vector.broadcast %cst_69 : f32 to vector<8x128xf32>
    %158 = arith.mulf %48#18, %157 : vector<8x128xf32>
    %cst_70 = arith.constant 1.000000e+00 : f32
    %159 = vector.broadcast %cst_70 : f32 to vector<8x128xf32>
    %160 = arith.subf %159, %158 : vector<8x128xf32>
    %cst_71 = arith.constant 0.000000e+00 : f32
    %161 = vector.broadcast %cst_71 : f32 to vector<8x128xf32>
    %162 = arith.select %156, %160, %161 : vector<8x128xi1>, vector<8x128xf32>
    %163 = arith.mulf %154, %162 : vector<8x128xf32>
    %164 = arith.addf %151, %163 : vector<8x128xf32>
    %cst_72 = arith.constant 1.000000e+00 : f32
    %165 = vector.broadcast %cst_72 : f32 to vector<8x128xf32>
    %166 = arith.subf %165, %162 : vector<8x128xf32>
    %167 = arith.mulf %154, %166 : vector<8x128xf32>
    %cst_73 = arith.constant 0x7F800000 : f32
    %168 = vector.broadcast %cst_73 : f32 to vector<8x128xf32>
    %169 = arith.cmpf olt, %48#9, %168 : vector<8x128xf32>
    %cst_74 = arith.constant 4.000000e+04 : f32
    %170 = vector.broadcast %cst_74 : f32 to vector<8x128xf32>
    %171 = arith.mulf %48#19, %170 : vector<8x128xf32>
    %cst_75 = arith.constant 1.000000e+00 : f32
    %172 = vector.broadcast %cst_75 : f32 to vector<8x128xf32>
    %173 = arith.subf %172, %171 : vector<8x128xf32>
    %cst_76 = arith.constant 0.000000e+00 : f32
    %174 = vector.broadcast %cst_76 : f32 to vector<8x128xf32>
    %175 = arith.select %169, %173, %174 : vector<8x128xi1>, vector<8x128xf32>
    %176 = arith.mulf %167, %175 : vector<8x128xf32>
    %177 = arith.addf %164, %176 : vector<8x128xf32>
    %c0 = arith.constant 0 : index
    %c0_77 = arith.constant 0 : index
    %178 = vector.load %arg6[%c0, %c0_77] : memref<16x128xf32, #tpu.memory_space<vmem>>, vector<8x128xf32>
    tpu.vector_store %arg6[%c0, %c0_77], %177 {strides = array<i32>} : memref<16x128xf32, #tpu.memory_space<vmem>>, vector<8x128xf32>,
    %cst_78 = arith.constant 0x7F800000 : f32
    %179 = vector.broadcast %cst_78 : f32 to vector<8x128xf32>
    %180 = arith.cmpf olt, %48#0, %179 : vector<8x128xf32>
    %cst_79 = arith.constant -1.000000e+00 : f32
    %181 = vector.broadcast %cst_79 : f32 to vector<8x128xf32>
    %182 = arith.select %180, %48#0, %181 : vector<8x128xi1>, vector<8x128xf32>
    %c0_80 = arith.constant 0 : index
    %c0_81 = arith.constant 0 : index
    %c0_82 = arith.constant 0 : index
    %183 = vector.load %arg7[%c0_80, %c0_81, %c0_82] : memref<10x16x128xf32, #tpu.memory_space<vmem>>, vector<1x8x128xf32>
    %184 = vector.shape_cast %183 : vector<1x8x128xf32> to vector<8x128xf32>
    %185 = vector.shape_cast %182 : vector<8x128xf32> to vector<1x8x128xf32>
    tpu.vector_store %arg7[%c0_80, %c0_81, %c0_82], %185 {strides = array<i32>} : memref<10x16x128xf32, #tpu.memory_space<vmem>>, vector<1x8x128xf32>,
    %cst_83 = arith.constant 0x7F800000 : f32
    %186 = vector.broadcast %cst_83 : f32 to vector<8x128xf32>
    %187 = arith.cmpf olt, %48#1, %186 : vector<8x128xf32>
    %cst_84 = arith.constant -1.000000e+00 : f32
    %188 = vector.broadcast %cst_84 : f32 to vector<8x128xf32>
    %189 = arith.select %187, %48#1, %188 : vector<8x128xi1>, vector<8x128xf32>
    %c1 = arith.constant 1 : index
    %c0_85 = arith.constant 0 : index
    %c0_86 = arith.constant 0 : index
    %190 = vector.load %arg7[%c1, %c0_85, %c0_86] : memref<10x16x128xf32, #tpu.memory_space<vmem>>, vector<1x8x128xf32>
    %191 = vector.shape_cast %190 : vector<1x8x128xf32> to vector<8x128xf32>
    %192 = vector.shape_cast %189 : vector<8x128xf32> to vector<1x8x128xf32>
    tpu.vector_store %arg7[%c1, %c0_85, %c0_86], %192 {strides = array<i32>} : memref<10x16x128xf32, #tpu.memory_space<vmem>>, vector<1x8x128xf32>,
    %cst_87 = arith.constant 0x7F800000 : f32
    %193 = vector.broadcast %cst_87 : f32 to vector<8x128xf32>
    %194 = arith.cmpf olt, %48#2, %193 : vector<8x128xf32>
    %cst_88 = arith.constant -1.000000e+00 : f32
    %195 = vector.broadcast %cst_88 : f32 to vector<8x128xf32>
    %196 = arith.select %194, %48#2, %195 : vector<8x128xi1>, vector<8x128xf32>
    %c2 = arith.constant 2 : index
    %c0_89 = arith.constant 0 : index
    %c0_90 = arith.constant 0 : index
    %197 = vector.load %arg7[%c2, %c0_89, %c0_90] : memref<10x16x128xf32, #tpu.memory_space<vmem>>, vector<1x8x128xf32>
    %198 = vector.shape_cast %197 : vector<1x8x128xf32> to vector<8x128xf32>
    %199 = vector.shape_cast %196 : vector<8x128xf32> to vector<1x8x128xf32>
    tpu.vector_store %arg7[%c2, %c0_89, %c0_90], %199 {strides = array<i32>} : memref<10x16x128xf32, #tpu.memory_space<vmem>>, vector<1x8x128xf32>,
    %cst_91 = arith.constant 0x7F800000 : f32
    %200 = vector.broadcast %cst_91 : f32 to vector<8x128xf32>
    %201 = arith.cmpf olt, %48#3, %200 : vector<8x128xf32>
    %cst_92 = arith.constant -1.000000e+00 : f32
    %202 = vector.broadcast %cst_92 : f32 to vector<8x128xf32>
    %203 = arith.select %201, %48#3, %202 : vector<8x128xi1>, vector<8x128xf32>
    %c3 = arith.constant 3 : index
    %c0_93 = arith.constant 0 : index
    %c0_94 = arith.constant 0 : index
    %204 = vector.load %arg7[%c3, %c0_93, %c0_94] : memref<10x16x128xf32, #tpu.memory_space<vmem>>, vector<1x8x128xf32>
    %205 = vector.shape_cast %204 : vector<1x8x128xf32> to vector<8x128xf32>
    %206 = vector.shape_cast %203 : vector<8x128xf32> to vector<1x8x128xf32>
    tpu.vector_store %arg7[%c3, %c0_93, %c0_94], %206 {strides = array<i32>} : memref<10x16x128xf32, #tpu.memory_space<vmem>>, vector<1x8x128xf32>,
    %cst_95 = arith.constant 0x7F800000 : f32
    %207 = vector.broadcast %cst_95 : f32 to vector<8x128xf32>
    %208 = arith.cmpf olt, %48#4, %207 : vector<8x128xf32>
    %cst_96 = arith.constant -1.000000e+00 : f32
    %209 = vector.broadcast %cst_96 : f32 to vector<8x128xf32>
    %210 = arith.select %208, %48#4, %209 : vector<8x128xi1>, vector<8x128xf32>
    %c4 = arith.constant 4 : index
    %c0_97 = arith.constant 0 : index
    %c0_98 = arith.constant 0 : index
    %211 = vector.load %arg7[%c4, %c0_97, %c0_98] : memref<10x16x128xf32, #tpu.memory_space<vmem>>, vector<1x8x128xf32>
    %212 = vector.shape_cast %211 : vector<1x8x128xf32> to vector<8x128xf32>
    %213 = vector.shape_cast %210 : vector<8x128xf32> to vector<1x8x128xf32>
    tpu.vector_store %arg7[%c4, %c0_97, %c0_98], %213 {strides = array<i32>} : memref<10x16x128xf32, #tpu.memory_space<vmem>>, vector<1x8x128xf32>,
    %cst_99 = arith.constant 0x7F800000 : f32
    %214 = vector.broadcast %cst_99 : f32 to vector<8x128xf32>
    %215 = arith.cmpf olt, %48#5, %214 : vector<8x128xf32>
    %cst_100 = arith.constant -1.000000e+00 : f32
    %216 = vector.broadcast %cst_100 : f32 to vector<8x128xf32>
    %217 = arith.select %215, %48#5, %216 : vector<8x128xi1>, vector<8x128xf32>
    %c5 = arith.constant 5 : index
    %c0_101 = arith.constant 0 : index
    %c0_102 = arith.constant 0 : index
    %218 = vector.load %arg7[%c5, %c0_101, %c0_102] : memref<10x16x128xf32, #tpu.memory_space<vmem>>, vector<1x8x128xf32>
    %219 = vector.shape_cast %218 : vector<1x8x128xf32> to vector<8x128xf32>
    %220 = vector.shape_cast %217 : vector<8x128xf32> to vector<1x8x128xf32>
    tpu.vector_store %arg7[%c5, %c0_101, %c0_102], %220 {strides = array<i32>} : memref<10x16x128xf32, #tpu.memory_space<vmem>>, vector<1x8x128xf32>,
    %cst_103 = arith.constant 0x7F800000 : f32
    %221 = vector.broadcast %cst_103 : f32 to vector<8x128xf32>
    %222 = arith.cmpf olt, %48#6, %221 : vector<8x128xf32>
    %cst_104 = arith.constant -1.000000e+00 : f32
    %223 = vector.broadcast %cst_104 : f32 to vector<8x128xf32>
    %224 = arith.select %222, %48#6, %223 : vector<8x128xi1>, vector<8x128xf32>
    %c6 = arith.constant 6 : index
    %c0_105 = arith.constant 0 : index
    %c0_106 = arith.constant 0 : index
    %225 = vector.load %arg7[%c6, %c0_105, %c0_106] : memref<10x16x128xf32, #tpu.memory_space<vmem>>, vector<1x8x128xf32>
    %226 = vector.shape_cast %225 : vector<1x8x128xf32> to vector<8x128xf32>
    %227 = vector.shape_cast %224 : vector<8x128xf32> to vector<1x8x128xf32>
    tpu.vector_store %arg7[%c6, %c0_105, %c0_106], %227 {strides = array<i32>} : memref<10x16x128xf32, #tpu.memory_space<vmem>>, vector<1x8x128xf32>,
    %cst_107 = arith.constant 0x7F800000 : f32
    %228 = vector.broadcast %cst_107 : f32 to vector<8x128xf32>
    %229 = arith.cmpf olt, %48#7, %228 : vector<8x128xf32>
    %cst_108 = arith.constant -1.000000e+00 : f32
    %230 = vector.broadcast %cst_108 : f32 to vector<8x128xf32>
    %231 = arith.select %229, %48#7, %230 : vector<8x128xi1>, vector<8x128xf32>
    %c7 = arith.constant 7 : index
    %c0_109 = arith.constant 0 : index
    %c0_110 = arith.constant 0 : index
    %232 = vector.load %arg7[%c7, %c0_109, %c0_110] : memref<10x16x128xf32, #tpu.memory_space<vmem>>, vector<1x8x128xf32>
    %233 = vector.shape_cast %232 : vector<1x8x128xf32> to vector<8x128xf32>
    %234 = vector.shape_cast %231 : vector<8x128xf32> to vector<1x8x128xf32>
    tpu.vector_store %arg7[%c7, %c0_109, %c0_110], %234 {strides = array<i32>} : memref<10x16x128xf32, #tpu.memory_space<vmem>>, vector<1x8x128xf32>,
    %cst_111 = arith.constant 0x7F800000 : f32
    %235 = vector.broadcast %cst_111 : f32 to vector<8x128xf32>
    %236 = arith.cmpf olt, %48#8, %235 : vector<8x128xf32>
    %cst_112 = arith.constant -1.000000e+00 : f32
    %237 = vector.broadcast %cst_112 : f32 to vector<8x128xf32>
    %238 = arith.select %236, %48#8, %237 : vector<8x128xi1>, vector<8x128xf32>
    %c8 = arith.constant 8 : index
    %c0_113 = arith.constant 0 : index
    %c0_114 = arith.constant 0 : index
    %239 = vector.load %arg7[%c8, %c0_113, %c0_114] : memref<10x16x128xf32, #tpu.memory_space<vmem>>, vector<1x8x128xf32>
    %240 = vector.shape_cast %239 : vector<1x8x128xf32> to vector<8x128xf32>
    %241 = vector.shape_cast %238 : vector<8x128xf32> to vector<1x8x128xf32>
    tpu.vector_store %arg7[%c8, %c0_113, %c0_114], %241 {strides = array<i32>} : memref<10x16x128xf32, #tpu.memory_space<vmem>>, vector<1x8x128xf32>,
    %cst_115 = arith.constant 0x7F800000 : f32
    %242 = vector.broadcast %cst_115 : f32 to vector<8x128xf32>
    %243 = arith.cmpf olt, %48#9, %242 : vector<8x128xf32>
    %cst_116 = arith.constant -1.000000e+00 : f32
    %244 = vector.broadcast %cst_116 : f32 to vector<8x128xf32>
    %245 = arith.select %243, %48#9, %244 : vector<8x128xi1>, vector<8x128xf32>
    %c9 = arith.constant 9 : index
    %c0_117 = arith.constant 0 : index
    %c0_118 = arith.constant 0 : index
    %246 = vector.load %arg7[%c9, %c0_117, %c0_118] : memref<10x16x128xf32, #tpu.memory_space<vmem>>, vector<1x8x128xf32>
    %247 = vector.shape_cast %246 : vector<1x8x128xf32> to vector<8x128xf32>
    %248 = vector.shape_cast %245 : vector<8x128xf32> to vector<1x8x128xf32>
    tpu.vector_store %arg7[%c9, %c0_117, %c0_118], %248 {strides = array<i32>} : memref<10x16x128xf32, #tpu.memory_space<vmem>>, vector<1x8x128xf32>,
    %c2_i32_119 = arith.constant 2 : i32
    %249 = arith.muli %arg0, %c2_i32_119 : i32
    %c1_i32_120 = arith.constant 1 : i32
    %250 = arith.addi %249, %c1_i32_120 : i32
    %c8_i32_121 = arith.constant 8 : i32
    %251 = arith.muli %250, %c8_i32_121 : i32
    %252 = arith.sitofp %251 : i32 to f32
    %253 = vector.broadcast %252 : f32 to vector<8x128xf32>
    %254 = arith.addf %3, %253 : vector<8x128xf32>
    %cst_122 = arith.constant 2.000000e+00 : f32
    %255 = vector.broadcast %cst_122 : f32 to vector<8x128xf32>
    %256 = arith.mulf %255, %254 : vector<8x128xf32>
    %cst_123 = arith.constant 6.300000e+01 : f32
    %257 = vector.broadcast %cst_123 : f32 to vector<8x128xf32>
    %258 = arith.subf %257, %256 : vector<8x128xf32>
    %cst_124 = arith.constant 6.400000e+01 : f32
    %259 = vector.broadcast %cst_124 : f32 to vector<8x128xf32>
    %260 = arith.divf %258, %259 : vector<8x128xf32>
    %261 = arith.index_cast %250 : i32 to index
    %262 = memref.load %arg1[%261] : memref<8xi32, #tpu.memory_space<smem>>
    %263 = arith.index_cast %250 : i32 to index
    %264 = memref.load %arg2[%263] : memref<8xi32, #tpu.memory_space<smem>>
    %cst_125 = arith.constant 0x7F800000 : f32
    %265 = vector.broadcast %cst_125 : f32 to vector<8x128xf32>
    %cst_126 = arith.constant 0x7F800000 : f32
    %266 = vector.broadcast %cst_126 : f32 to vector<8x128xf32>
    %cst_127 = arith.constant 0x7F800000 : f32
    %267 = vector.broadcast %cst_127 : f32 to vector<8x128xf32>
    %cst_128 = arith.constant 0x7F800000 : f32
    %268 = vector.broadcast %cst_128 : f32 to vector<8x128xf32>
    %cst_129 = arith.constant 0x7F800000 : f32
    %269 = vector.broadcast %cst_129 : f32 to vector<8x128xf32>
    %cst_130 = arith.constant 0x7F800000 : f32
    %270 = vector.broadcast %cst_130 : f32 to vector<8x128xf32>
    %cst_131 = arith.constant 0x7F800000 : f32
    %271 = vector.broadcast %cst_131 : f32 to vector<8x128xf32>
    %cst_132 = arith.constant 0x7F800000 : f32
    %272 = vector.broadcast %cst_132 : f32 to vector<8x128xf32>
    %cst_133 = arith.constant 0x7F800000 : f32
    %273 = vector.broadcast %cst_133 : f32 to vector<8x128xf32>
    %cst_134 = arith.constant 0x7F800000 : f32
    %274 = vector.broadcast %cst_134 : f32 to vector<8x128xf32>
    %cst_135 = arith.constant 0.000000e+00 : f32
    %275 = vector.broadcast %cst_135 : f32 to vector<8x128xf32>
    %cst_136 = arith.constant 0.000000e+00 : f32
    %276 = vector.broadcast %cst_136 : f32 to vector<8x128xf32>
    %cst_137 = arith.constant 0.000000e+00 : f32
    %277 = vector.broadcast %cst_137 : f32 to vector<8x128xf32>
    %cst_138 = arith.constant 0.000000e+00 : f32
    %278 = vector.broadcast %cst_138 : f32 to vector<8x128xf32>
    %cst_139 = arith.constant 0.000000e+00 : f32
    %279 = vector.broadcast %cst_139 : f32 to vector<8x128xf32>
    %cst_140 = arith.constant 0.000000e+00 : f32
    %280 = vector.broadcast %cst_140 : f32 to vector<8x128xf32>
    %cst_141 = arith.constant 0.000000e+00 : f32
    %281 = vector.broadcast %cst_141 : f32 to vector<8x128xf32>
    %cst_142 = arith.constant 0.000000e+00 : f32
    %282 = vector.broadcast %cst_142 : f32 to vector<8x128xf32>
    %cst_143 = arith.constant 0.000000e+00 : f32
    %283 = vector.broadcast %cst_143 : f32 to vector<8x128xf32>
    %cst_144 = arith.constant 0.000000e+00 : f32
    %284 = vector.broadcast %cst_144 : f32 to vector<8x128xf32>
    %c0_i32_145 = arith.constant 0 : i32
    %285 = arith.subi %264, %c0_i32_145 : i32
    %286 = arith.addi %c0_i32_145, %285 : i32
    %c1_i32_146 = arith.constant 1 : i32
    %287:20 = scf.for %arg8 = %c0_i32_145 to %286 step %c1_i32_146 iter_args(%arg9 = %265, %arg10 = %266, %arg11 = %267, %arg12 = %268, %arg13 = %269, %arg14 = %270, %arg15 = %271, %arg16 = %272, %arg17 = %273, %arg18 = %274, %arg19 = %275, %arg20 = %276, %arg21 = %277, %arg22 = %278, %arg23 = %279, %arg24 = %280, %arg25 = %281, %arg26 = %282, %arg27 = %283, %arg28 = %284) -> (vector<8x128xf32>, vector<8x128xf32>, vector<8x128xf32>, vector<8x128xf32>, vector<8x128xf32>, vector<8x128xf32>, vector<8x128xf32>, vector<8x128xf32>, vector<8x128xf32>, vector<8x128xf32>, vector<8x128xf32>, vector<8x128xf32>, vector<8x128xf32>, vector<8x128xf32>, vector<8x128xf32>, vector<8x128xf32>, vector<8x128xf32>, vector<8x128xf32>, vector<8x128xf32>, vector<8x128xf32>)  : i32 {
      %c2_i32_250 = arith.constant 2 : i32
      %488 = arith.muli %arg8, %c2_i32_250 : i32
      %489 = arith.addi %262, %488 : i32
      %c0_i32_251 = arith.constant 0 : i32
      %490 = arith.addi %489, %c0_i32_251 : i32
      %491 = arith.index_cast %490 : i32 to index
      %492 = memref.load %arg3[%491] : memref<2050xf32, #tpu.memory_space<smem>>
      %493 = arith.index_cast %490 : i32 to index
      %494 = memref.load %arg4[%493] : memref<2050xf32, #tpu.memory_space<smem>>
      %495 = arith.index_cast %490 : i32 to index
      %496 = memref.load %arg5[%495] : memref<2050xf32, #tpu.memory_space<smem>>
      %497 = vector.broadcast %492 : f32 to vector<8x128xf32>
      %498 = arith.subf %9, %497 : vector<8x128xf32>
      %499 = vector.broadcast %494 : f32 to vector<8x128xf32>
      %500 = arith.subf %260, %499 : vector<8x128xf32>
      %501 = arith.mulf %498, %498 : vector<8x128xf32>
      %502 = arith.mulf %500, %500 : vector<8x128xf32>
      %503 = arith.addf %501, %502 : vector<8x128xf32>
      %cst_252 = arith.constant 2.500000e-05 : f32
      %504 = vector.broadcast %cst_252 : f32 to vector<8x128xf32>
      %505 = arith.cmpf olt, %503, %504 : vector<8x128xf32>
      %cst_253 = arith.constant 0x7F800000 : f32
      %506 = vector.broadcast %496 : f32 to vector<8x128xf32>
      %507 = vector.broadcast %cst_253 : f32 to vector<8x128xf32>
      %508 = arith.select %505, %506, %507 : vector<8x128xi1>, vector<8x128xf32>
      %509 = arith.cmpf olt, %508, %arg9 : vector<8x128xf32>
      %510 = arith.select %509, %508, %arg9 : vector<8x128xi1>, vector<8x128xf32>
      %511 = arith.select %509, %503, %arg19 : vector<8x128xi1>, vector<8x128xf32>
      %512 = arith.select %509, %arg9, %508 : vector<8x128xi1>, vector<8x128xf32>
      %513 = arith.select %509, %arg19, %503 : vector<8x128xi1>, vector<8x128xf32>
      %514 = arith.cmpf olt, %512, %arg10 : vector<8x128xf32>
      %515 = arith.select %514, %512, %arg10 : vector<8x128xi1>, vector<8x128xf32>
      %516 = arith.select %514, %513, %arg20 : vector<8x128xi1>, vector<8x128xf32>
      %517 = arith.select %514, %arg10, %512 : vector<8x128xi1>, vector<8x128xf32>
      %518 = arith.select %514, %arg20, %513 : vector<8x128xi1>, vector<8x128xf32>
      %519 = arith.cmpf olt, %517, %arg11 : vector<8x128xf32>
      %520 = arith.select %519, %517, %arg11 : vector<8x128xi1>, vector<8x128xf32>
      %521 = arith.select %519, %518, %arg21 : vector<8x128xi1>, vector<8x128xf32>
      %522 = arith.select %519, %arg11, %517 : vector<8x128xi1>, vector<8x128xf32>
      %523 = arith.select %519, %arg21, %518 : vector<8x128xi1>, vector<8x128xf32>
      %524 = arith.cmpf olt, %522, %arg12 : vector<8x128xf32>
      %525 = arith.select %524, %522, %arg12 : vector<8x128xi1>, vector<8x128xf32>
      %526 = arith.select %524, %523, %arg22 : vector<8x128xi1>, vector<8x128xf32>
      %527 = arith.select %524, %arg12, %522 : vector<8x128xi1>, vector<8x128xf32>
      %528 = arith.select %524, %arg22, %523 : vector<8x128xi1>, vector<8x128xf32>
      %529 = arith.cmpf olt, %527, %arg13 : vector<8x128xf32>
      %530 = arith.select %529, %527, %arg13 : vector<8x128xi1>, vector<8x128xf32>
      %531 = arith.select %529, %528, %arg23 : vector<8x128xi1>, vector<8x128xf32>
      %532 = arith.select %529, %arg13, %527 : vector<8x128xi1>, vector<8x128xf32>
      %533 = arith.select %529, %arg23, %528 : vector<8x128xi1>, vector<8x128xf32>
      %534 = arith.cmpf olt, %532, %arg14 : vector<8x128xf32>
      %535 = arith.select %534, %532, %arg14 : vector<8x128xi1>, vector<8x128xf32>
      %536 = arith.select %534, %533, %arg24 : vector<8x128xi1>, vector<8x128xf32>
      %537 = arith.select %534, %arg14, %532 : vector<8x128xi1>, vector<8x128xf32>
      %538 = arith.select %534, %arg24, %533 : vector<8x128xi1>, vector<8x128xf32>
      %539 = arith.cmpf olt, %537, %arg15 : vector<8x128xf32>
      %540 = arith.select %539, %537, %arg15 : vector<8x128xi1>, vector<8x128xf32>
      %541 = arith.select %539, %538, %arg25 : vector<8x128xi1>, vector<8x128xf32>
      %542 = arith.select %539, %arg15, %537 : vector<8x128xi1>, vector<8x128xf32>
      %543 = arith.select %539, %arg25, %538 : vector<8x128xi1>, vector<8x128xf32>
      %544 = arith.cmpf olt, %542, %arg16 : vector<8x128xf32>
      %545 = arith.select %544, %542, %arg16 : vector<8x128xi1>, vector<8x128xf32>
      %546 = arith.select %544, %543, %arg26 : vector<8x128xi1>, vector<8x128xf32>
      %547 = arith.select %544, %arg16, %542 : vector<8x128xi1>, vector<8x128xf32>
      %548 = arith.select %544, %arg26, %543 : vector<8x128xi1>, vector<8x128xf32>
      %549 = arith.cmpf olt, %547, %arg17 : vector<8x128xf32>
      %550 = arith.select %549, %547, %arg17 : vector<8x128xi1>, vector<8x128xf32>
      %551 = arith.select %549, %548, %arg27 : vector<8x128xi1>, vector<8x128xf32>
      %552 = arith.select %549, %arg17, %547 : vector<8x128xi1>, vector<8x128xf32>
      %553 = arith.select %549, %arg27, %548 : vector<8x128xi1>, vector<8x128xf32>
      %554 = arith.cmpf olt, %552, %arg18 : vector<8x128xf32>
      %555 = arith.select %554, %552, %arg18 : vector<8x128xi1>, vector<8x128xf32>
      %556 = arith.select %554, %553, %arg28 : vector<8x128xi1>, vector<8x128xf32>
      %557 = arith.select %554, %arg18, %552 : vector<8x128xi1>, vector<8x128xf32>
      %558 = arith.select %554, %arg28, %553 : vector<8x128xi1>, vector<8x128xf32>
      %c1_i32_254 = arith.constant 1 : i32
      %559 = arith.addi %489, %c1_i32_254 : i32
      %560 = arith.index_cast %559 : i32 to index
      %561 = memref.load %arg3[%560] : memref<2050xf32, #tpu.memory_space<smem>>
      %562 = arith.index_cast %559 : i32 to index
      %563 = memref.load %arg4[%562] : memref<2050xf32, #tpu.memory_space<smem>>
      %564 = arith.index_cast %559 : i32 to index
      %565 = memref.load %arg5[%564] : memref<2050xf32, #tpu.memory_space<smem>>
      %566 = vector.broadcast %561 : f32 to vector<8x128xf32>
      %567 = arith.subf %9, %566 : vector<8x128xf32>
      %568 = vector.broadcast %563 : f32 to vector<8x128xf32>
      %569 = arith.subf %260, %568 : vector<8x128xf32>
      %570 = arith.mulf %567, %567 : vector<8x128xf32>
      %571 = arith.mulf %569, %569 : vector<8x128xf32>
      %572 = arith.addf %570, %571 : vector<8x128xf32>
      %cst_255 = arith.constant 2.500000e-05 : f32
      %573 = vector.broadcast %cst_255 : f32 to vector<8x128xf32>
      %574 = arith.cmpf olt, %572, %573 : vector<8x128xf32>
      %cst_256 = arith.constant 0x7F800000 : f32
      %575 = vector.broadcast %565 : f32 to vector<8x128xf32>
      %576 = vector.broadcast %cst_256 : f32 to vector<8x128xf32>
      %577 = arith.select %574, %575, %576 : vector<8x128xi1>, vector<8x128xf32>
      %578 = arith.cmpf olt, %577, %510 : vector<8x128xf32>
      %579 = arith.select %578, %577, %510 : vector<8x128xi1>, vector<8x128xf32>
      %580 = arith.select %578, %572, %511 : vector<8x128xi1>, vector<8x128xf32>
      %581 = arith.select %578, %510, %577 : vector<8x128xi1>, vector<8x128xf32>
      %582 = arith.select %578, %511, %572 : vector<8x128xi1>, vector<8x128xf32>
      %583 = arith.cmpf olt, %581, %515 : vector<8x128xf32>
      %584 = arith.select %583, %581, %515 : vector<8x128xi1>, vector<8x128xf32>
      %585 = arith.select %583, %582, %516 : vector<8x128xi1>, vector<8x128xf32>
      %586 = arith.select %583, %515, %581 : vector<8x128xi1>, vector<8x128xf32>
      %587 = arith.select %583, %516, %582 : vector<8x128xi1>, vector<8x128xf32>
      %588 = arith.cmpf olt, %586, %520 : vector<8x128xf32>
      %589 = arith.select %588, %586, %520 : vector<8x128xi1>, vector<8x128xf32>
      %590 = arith.select %588, %587, %521 : vector<8x128xi1>, vector<8x128xf32>
      %591 = arith.select %588, %520, %586 : vector<8x128xi1>, vector<8x128xf32>
      %592 = arith.select %588, %521, %587 : vector<8x128xi1>, vector<8x128xf32>
      %593 = arith.cmpf olt, %591, %525 : vector<8x128xf32>
      %594 = arith.select %593, %591, %525 : vector<8x128xi1>, vector<8x128xf32>
      %595 = arith.select %593, %592, %526 : vector<8x128xi1>, vector<8x128xf32>
      %596 = arith.select %593, %525, %591 : vector<8x128xi1>, vector<8x128xf32>
      %597 = arith.select %593, %526, %592 : vector<8x128xi1>, vector<8x128xf32>
      %598 = arith.cmpf olt, %596, %530 : vector<8x128xf32>
      %599 = arith.select %598, %596, %530 : vector<8x128xi1>, vector<8x128xf32>
      %600 = arith.select %598, %597, %531 : vector<8x128xi1>, vector<8x128xf32>
      %601 = arith.select %598, %530, %596 : vector<8x128xi1>, vector<8x128xf32>
      %602 = arith.select %598, %531, %597 : vector<8x128xi1>, vector<8x128xf32>
      %603 = arith.cmpf olt, %601, %535 : vector<8x128xf32>
      %604 = arith.select %603, %601, %535 : vector<8x128xi1>, vector<8x128xf32>
      %605 = arith.select %603, %602, %536 : vector<8x128xi1>, vector<8x128xf32>
      %606 = arith.select %603, %535, %601 : vector<8x128xi1>, vector<8x128xf32>
      %607 = arith.select %603, %536, %602 : vector<8x128xi1>, vector<8x128xf32>
      %608 = arith.cmpf olt, %606, %540 : vector<8x128xf32>
      %609 = arith.select %608, %606, %540 : vector<8x128xi1>, vector<8x128xf32>
      %610 = arith.select %608, %607, %541 : vector<8x128xi1>, vector<8x128xf32>
      %611 = arith.select %608, %540, %606 : vector<8x128xi1>, vector<8x128xf32>
      %612 = arith.select %608, %541, %607 : vector<8x128xi1>, vector<8x128xf32>
      %613 = arith.cmpf olt, %611, %545 : vector<8x128xf32>
      %614 = arith.select %613, %611, %545 : vector<8x128xi1>, vector<8x128xf32>
      %615 = arith.select %613, %612, %546 : vector<8x128xi1>, vector<8x128xf32>
      %616 = arith.select %613, %545, %611 : vector<8x128xi1>, vector<8x128xf32>
      %617 = arith.select %613, %546, %612 : vector<8x128xi1>, vector<8x128xf32>
      %618 = arith.cmpf olt, %616, %550 : vector<8x128xf32>
      %619 = arith.select %618, %616, %550 : vector<8x128xi1>, vector<8x128xf32>
      %620 = arith.select %618, %617, %551 : vector<8x128xi1>, vector<8x128xf32>
      %621 = arith.select %618, %550, %616 : vector<8x128xi1>, vector<8x128xf32>
      %622 = arith.select %618, %551, %617 : vector<8x128xi1>, vector<8x128xf32>
      %623 = arith.cmpf olt, %621, %555 : vector<8x128xf32>
      %624 = arith.select %623, %621, %555 : vector<8x128xi1>, vector<8x128xf32>
      %625 = arith.select %623, %622, %556 : vector<8x128xi1>, vector<8x128xf32>
      %626 = arith.select %623, %555, %621 : vector<8x128xi1>, vector<8x128xf32>
      %627 = arith.select %623, %556, %622 : vector<8x128xi1>, vector<8x128xf32>
      scf.yield %579, %584, %589, %594, %599, %604, %609, %614, %619, %624, %580, %585, %590, %595, %600, %605, %610, %615, %620, %625 : vector<8x128xf32>, vector<8x128xf32>, vector<8x128xf32>, vector<8x128xf32>, vector<8x128xf32>, vector<8x128xf32>, vector<8x128xf32>, vector<8x128xf32>, vector<8x128xf32>, vector<8x128xf32>, vector<8x128xf32>, vector<8x128xf32>, vector<8x128xf32>, vector<8x128xf32>, vector<8x128xf32>, vector<8x128xf32>, vector<8x128xf32>, vector<8x128xf32>, vector<8x128xf32>, vector<8x128xf32>
    }
    %cst_147 = arith.constant 1.000000e+00 : f32
    %288 = vector.broadcast %cst_147 : f32 to vector<8x128xf32>
    %cst_148 = arith.constant 0.000000e+00 : f32
    %289 = vector.broadcast %cst_148 : f32 to vector<8x128xf32>
    %cst_149 = arith.constant 0x7F800000 : f32
    %290 = vector.broadcast %cst_149 : f32 to vector<8x128xf32>
    %291 = arith.cmpf olt, %287#0, %290 : vector<8x128xf32>
    %cst_150 = arith.constant 4.000000e+04 : f32
    %292 = vector.broadcast %cst_150 : f32 to vector<8x128xf32>
    %293 = arith.mulf %287#10, %292 : vector<8x128xf32>
    %cst_151 = arith.constant 1.000000e+00 : f32
    %294 = vector.broadcast %cst_151 : f32 to vector<8x128xf32>
    %295 = arith.subf %294, %293 : vector<8x128xf32>
    %cst_152 = arith.constant 0.000000e+00 : f32
    %296 = vector.broadcast %cst_152 : f32 to vector<8x128xf32>
    %297 = arith.select %291, %295, %296 : vector<8x128xi1>, vector<8x128xf32>
    %298 = arith.mulf %288, %297 : vector<8x128xf32>
    %299 = arith.addf %289, %298 : vector<8x128xf32>
    %cst_153 = arith.constant 1.000000e+00 : f32
    %300 = vector.broadcast %cst_153 : f32 to vector<8x128xf32>
    %301 = arith.subf %300, %297 : vector<8x128xf32>
    %302 = arith.mulf %288, %301 : vector<8x128xf32>
    %cst_154 = arith.constant 0x7F800000 : f32
    %303 = vector.broadcast %cst_154 : f32 to vector<8x128xf32>
    %304 = arith.cmpf olt, %287#1, %303 : vector<8x128xf32>
    %cst_155 = arith.constant 4.000000e+04 : f32
    %305 = vector.broadcast %cst_155 : f32 to vector<8x128xf32>
    %306 = arith.mulf %287#11, %305 : vector<8x128xf32>
    %cst_156 = arith.constant 1.000000e+00 : f32
    %307 = vector.broadcast %cst_156 : f32 to vector<8x128xf32>
    %308 = arith.subf %307, %306 : vector<8x128xf32>
    %cst_157 = arith.constant 0.000000e+00 : f32
    %309 = vector.broadcast %cst_157 : f32 to vector<8x128xf32>
    %310 = arith.select %304, %308, %309 : vector<8x128xi1>, vector<8x128xf32>
    %311 = arith.mulf %302, %310 : vector<8x128xf32>
    %312 = arith.addf %299, %311 : vector<8x128xf32>
    %cst_158 = arith.constant 1.000000e+00 : f32
    %313 = vector.broadcast %cst_158 : f32 to vector<8x128xf32>
    %314 = arith.subf %313, %310 : vector<8x128xf32>
    %315 = arith.mulf %302, %314 : vector<8x128xf32>
    %cst_159 = arith.constant 0x7F800000 : f32
    %316 = vector.broadcast %cst_159 : f32 to vector<8x128xf32>
    %317 = arith.cmpf olt, %287#2, %316 : vector<8x128xf32>
    %cst_160 = arith.constant 4.000000e+04 : f32
    %318 = vector.broadcast %cst_160 : f32 to vector<8x128xf32>
    %319 = arith.mulf %287#12, %318 : vector<8x128xf32>
    %cst_161 = arith.constant 1.000000e+00 : f32
    %320 = vector.broadcast %cst_161 : f32 to vector<8x128xf32>
    %321 = arith.subf %320, %319 : vector<8x128xf32>
    %cst_162 = arith.constant 0.000000e+00 : f32
    %322 = vector.broadcast %cst_162 : f32 to vector<8x128xf32>
    %323 = arith.select %317, %321, %322 : vector<8x128xi1>, vector<8x128xf32>
    %324 = arith.mulf %315, %323 : vector<8x128xf32>
    %325 = arith.addf %312, %324 : vector<8x128xf32>
    %cst_163 = arith.constant 1.000000e+00 : f32
    %326 = vector.broadcast %cst_163 : f32 to vector<8x128xf32>
    %327 = arith.subf %326, %323 : vector<8x128xf32>
    %328 = arith.mulf %315, %327 : vector<8x128xf32>
    %cst_164 = arith.constant 0x7F800000 : f32
    %329 = vector.broadcast %cst_164 : f32 to vector<8x128xf32>
    %330 = arith.cmpf olt, %287#3, %329 : vector<8x128xf32>
    %cst_165 = arith.constant 4.000000e+04 : f32
    %331 = vector.broadcast %cst_165 : f32 to vector<8x128xf32>
    %332 = arith.mulf %287#13, %331 : vector<8x128xf32>
    %cst_166 = arith.constant 1.000000e+00 : f32
    %333 = vector.broadcast %cst_166 : f32 to vector<8x128xf32>
    %334 = arith.subf %333, %332 : vector<8x128xf32>
    %cst_167 = arith.constant 0.000000e+00 : f32
    %335 = vector.broadcast %cst_167 : f32 to vector<8x128xf32>
    %336 = arith.select %330, %334, %335 : vector<8x128xi1>, vector<8x128xf32>
    %337 = arith.mulf %328, %336 : vector<8x128xf32>
    %338 = arith.addf %325, %337 : vector<8x128xf32>
    %cst_168 = arith.constant 1.000000e+00 : f32
    %339 = vector.broadcast %cst_168 : f32 to vector<8x128xf32>
    %340 = arith.subf %339, %336 : vector<8x128xf32>
    %341 = arith.mulf %328, %340 : vector<8x128xf32>
    %cst_169 = arith.constant 0x7F800000 : f32
    %342 = vector.broadcast %cst_169 : f32 to vector<8x128xf32>
    %343 = arith.cmpf olt, %287#4, %342 : vector<8x128xf32>
    %cst_170 = arith.constant 4.000000e+04 : f32
    %344 = vector.broadcast %cst_170 : f32 to vector<8x128xf32>
    %345 = arith.mulf %287#14, %344 : vector<8x128xf32>
    %cst_171 = arith.constant 1.000000e+00 : f32
    %346 = vector.broadcast %cst_171 : f32 to vector<8x128xf32>
    %347 = arith.subf %346, %345 : vector<8x128xf32>
    %cst_172 = arith.constant 0.000000e+00 : f32
    %348 = vector.broadcast %cst_172 : f32 to vector<8x128xf32>
    %349 = arith.select %343, %347, %348 : vector<8x128xi1>, vector<8x128xf32>
    %350 = arith.mulf %341, %349 : vector<8x128xf32>
    %351 = arith.addf %338, %350 : vector<8x128xf32>
    %cst_173 = arith.constant 1.000000e+00 : f32
    %352 = vector.broadcast %cst_173 : f32 to vector<8x128xf32>
    %353 = arith.subf %352, %349 : vector<8x128xf32>
    %354 = arith.mulf %341, %353 : vector<8x128xf32>
    %cst_174 = arith.constant 0x7F800000 : f32
    %355 = vector.broadcast %cst_174 : f32 to vector<8x128xf32>
    %356 = arith.cmpf olt, %287#5, %355 : vector<8x128xf32>
    %cst_175 = arith.constant 4.000000e+04 : f32
    %357 = vector.broadcast %cst_175 : f32 to vector<8x128xf32>
    %358 = arith.mulf %287#15, %357 : vector<8x128xf32>
    %cst_176 = arith.constant 1.000000e+00 : f32
    %359 = vector.broadcast %cst_176 : f32 to vector<8x128xf32>
    %360 = arith.subf %359, %358 : vector<8x128xf32>
    %cst_177 = arith.constant 0.000000e+00 : f32
    %361 = vector.broadcast %cst_177 : f32 to vector<8x128xf32>
    %362 = arith.select %356, %360, %361 : vector<8x128xi1>, vector<8x128xf32>
    %363 = arith.mulf %354, %362 : vector<8x128xf32>
    %364 = arith.addf %351, %363 : vector<8x128xf32>
    %cst_178 = arith.constant 1.000000e+00 : f32
    %365 = vector.broadcast %cst_178 : f32 to vector<8x128xf32>
    %366 = arith.subf %365, %362 : vector<8x128xf32>
    %367 = arith.mulf %354, %366 : vector<8x128xf32>
    %cst_179 = arith.constant 0x7F800000 : f32
    %368 = vector.broadcast %cst_179 : f32 to vector<8x128xf32>
    %369 = arith.cmpf olt, %287#6, %368 : vector<8x128xf32>
    %cst_180 = arith.constant 4.000000e+04 : f32
    %370 = vector.broadcast %cst_180 : f32 to vector<8x128xf32>
    %371 = arith.mulf %287#16, %370 : vector<8x128xf32>
    %cst_181 = arith.constant 1.000000e+00 : f32
    %372 = vector.broadcast %cst_181 : f32 to vector<8x128xf32>
    %373 = arith.subf %372, %371 : vector<8x128xf32>
    %cst_182 = arith.constant 0.000000e+00 : f32
    %374 = vector.broadcast %cst_182 : f32 to vector<8x128xf32>
    %375 = arith.select %369, %373, %374 : vector<8x128xi1>, vector<8x128xf32>
    %376 = arith.mulf %367, %375 : vector<8x128xf32>
    %377 = arith.addf %364, %376 : vector<8x128xf32>
    %cst_183 = arith.constant 1.000000e+00 : f32
    %378 = vector.broadcast %cst_183 : f32 to vector<8x128xf32>
    %379 = arith.subf %378, %375 : vector<8x128xf32>
    %380 = arith.mulf %367, %379 : vector<8x128xf32>
    %cst_184 = arith.constant 0x7F800000 : f32
    %381 = vector.broadcast %cst_184 : f32 to vector<8x128xf32>
    %382 = arith.cmpf olt, %287#7, %381 : vector<8x128xf32>
    %cst_185 = arith.constant 4.000000e+04 : f32
    %383 = vector.broadcast %cst_185 : f32 to vector<8x128xf32>
    %384 = arith.mulf %287#17, %383 : vector<8x128xf32>
    %cst_186 = arith.constant 1.000000e+00 : f32
    %385 = vector.broadcast %cst_186 : f32 to vector<8x128xf32>
    %386 = arith.subf %385, %384 : vector<8x128xf32>
    %cst_187 = arith.constant 0.000000e+00 : f32
    %387 = vector.broadcast %cst_187 : f32 to vector<8x128xf32>
    %388 = arith.select %382, %386, %387 : vector<8x128xi1>, vector<8x128xf32>
    %389 = arith.mulf %380, %388 : vector<8x128xf32>
    %390 = arith.addf %377, %389 : vector<8x128xf32>
    %cst_188 = arith.constant 1.000000e+00 : f32
    %391 = vector.broadcast %cst_188 : f32 to vector<8x128xf32>
    %392 = arith.subf %391, %388 : vector<8x128xf32>
    %393 = arith.mulf %380, %392 : vector<8x128xf32>
    %cst_189 = arith.constant 0x7F800000 : f32
    %394 = vector.broadcast %cst_189 : f32 to vector<8x128xf32>
    %395 = arith.cmpf olt, %287#8, %394 : vector<8x128xf32>
    %cst_190 = arith.constant 4.000000e+04 : f32
    %396 = vector.broadcast %cst_190 : f32 to vector<8x128xf32>
    %397 = arith.mulf %287#18, %396 : vector<8x128xf32>
    %cst_191 = arith.constant 1.000000e+00 : f32
    %398 = vector.broadcast %cst_191 : f32 to vector<8x128xf32>
    %399 = arith.subf %398, %397 : vector<8x128xf32>
    %cst_192 = arith.constant 0.000000e+00 : f32
    %400 = vector.broadcast %cst_192 : f32 to vector<8x128xf32>
    %401 = arith.select %395, %399, %400 : vector<8x128xi1>, vector<8x128xf32>
    %402 = arith.mulf %393, %401 : vector<8x128xf32>
    %403 = arith.addf %390, %402 : vector<8x128xf32>
    %cst_193 = arith.constant 1.000000e+00 : f32
    %404 = vector.broadcast %cst_193 : f32 to vector<8x128xf32>
    %405 = arith.subf %404, %401 : vector<8x128xf32>
    %406 = arith.mulf %393, %405 : vector<8x128xf32>
    %cst_194 = arith.constant 0x7F800000 : f32
    %407 = vector.broadcast %cst_194 : f32 to vector<8x128xf32>
    %408 = arith.cmpf olt, %287#9, %407 : vector<8x128xf32>
    %cst_195 = arith.constant 4.000000e+04 : f32
    %409 = vector.broadcast %cst_195 : f32 to vector<8x128xf32>
    %410 = arith.mulf %287#19, %409 : vector<8x128xf32>
    %cst_196 = arith.constant 1.000000e+00 : f32
    %411 = vector.broadcast %cst_196 : f32 to vector<8x128xf32>
    %412 = arith.subf %411, %410 : vector<8x128xf32>
    %cst_197 = arith.constant 0.000000e+00 : f32
    %413 = vector.broadcast %cst_197 : f32 to vector<8x128xf32>
    %414 = arith.select %408, %412, %413 : vector<8x128xi1>, vector<8x128xf32>
    %415 = arith.mulf %406, %414 : vector<8x128xf32>
    %416 = arith.addf %403, %415 : vector<8x128xf32>
    %c8_198 = arith.constant 8 : index
    %c0_199 = arith.constant 0 : index
    %417 = vector.load %arg6[%c8_198, %c0_199] : memref<16x128xf32, #tpu.memory_space<vmem>>, vector<8x128xf32>
    tpu.vector_store %arg6[%c8_198, %c0_199], %416 {strides = array<i32>} : memref<16x128xf32, #tpu.memory_space<vmem>>, vector<8x128xf32>,
    %cst_200 = arith.constant 0x7F800000 : f32
    %418 = vector.broadcast %cst_200 : f32 to vector<8x128xf32>
    %419 = arith.cmpf olt, %287#0, %418 : vector<8x128xf32>
    %cst_201 = arith.constant -1.000000e+00 : f32
    %420 = vector.broadcast %cst_201 : f32 to vector<8x128xf32>
    %421 = arith.select %419, %287#0, %420 : vector<8x128xi1>, vector<8x128xf32>
    %c0_202 = arith.constant 0 : index
    %c8_203 = arith.constant 8 : index
    %c0_204 = arith.constant 0 : index
    %422 = vector.load %arg7[%c0_202, %c8_203, %c0_204] : memref<10x16x128xf32, #tpu.memory_space<vmem>>, vector<1x8x128xf32>
    %423 = vector.shape_cast %422 : vector<1x8x128xf32> to vector<8x128xf32>
    %424 = vector.shape_cast %421 : vector<8x128xf32> to vector<1x8x128xf32>
    tpu.vector_store %arg7[%c0_202, %c8_203, %c0_204], %424 {strides = array<i32>} : memref<10x16x128xf32, #tpu.memory_space<vmem>>, vector<1x8x128xf32>,
    %cst_205 = arith.constant 0x7F800000 : f32
    %425 = vector.broadcast %cst_205 : f32 to vector<8x128xf32>
    %426 = arith.cmpf olt, %287#1, %425 : vector<8x128xf32>
    %cst_206 = arith.constant -1.000000e+00 : f32
    %427 = vector.broadcast %cst_206 : f32 to vector<8x128xf32>
    %428 = arith.select %426, %287#1, %427 : vector<8x128xi1>, vector<8x128xf32>
    %c1_207 = arith.constant 1 : index
    %c8_208 = arith.constant 8 : index
    %c0_209 = arith.constant 0 : index
    %429 = vector.load %arg7[%c1_207, %c8_208, %c0_209] : memref<10x16x128xf32, #tpu.memory_space<vmem>>, vector<1x8x128xf32>
    %430 = vector.shape_cast %429 : vector<1x8x128xf32> to vector<8x128xf32>
    %431 = vector.shape_cast %428 : vector<8x128xf32> to vector<1x8x128xf32>
    tpu.vector_store %arg7[%c1_207, %c8_208, %c0_209], %431 {strides = array<i32>} : memref<10x16x128xf32, #tpu.memory_space<vmem>>, vector<1x8x128xf32>,
    %cst_210 = arith.constant 0x7F800000 : f32
    %432 = vector.broadcast %cst_210 : f32 to vector<8x128xf32>
    %433 = arith.cmpf olt, %287#2, %432 : vector<8x128xf32>
    %cst_211 = arith.constant -1.000000e+00 : f32
    %434 = vector.broadcast %cst_211 : f32 to vector<8x128xf32>
    %435 = arith.select %433, %287#2, %434 : vector<8x128xi1>, vector<8x128xf32>
    %c2_212 = arith.constant 2 : index
    %c8_213 = arith.constant 8 : index
    %c0_214 = arith.constant 0 : index
    %436 = vector.load %arg7[%c2_212, %c8_213, %c0_214] : memref<10x16x128xf32, #tpu.memory_space<vmem>>, vector<1x8x128xf32>
    %437 = vector.shape_cast %436 : vector<1x8x128xf32> to vector<8x128xf32>
    %438 = vector.shape_cast %435 : vector<8x128xf32> to vector<1x8x128xf32>
    tpu.vector_store %arg7[%c2_212, %c8_213, %c0_214], %438 {strides = array<i32>} : memref<10x16x128xf32, #tpu.memory_space<vmem>>, vector<1x8x128xf32>,
    %cst_215 = arith.constant 0x7F800000 : f32
    %439 = vector.broadcast %cst_215 : f32 to vector<8x128xf32>
    %440 = arith.cmpf olt, %287#3, %439 : vector<8x128xf32>
    %cst_216 = arith.constant -1.000000e+00 : f32
    %441 = vector.broadcast %cst_216 : f32 to vector<8x128xf32>
    %442 = arith.select %440, %287#3, %441 : vector<8x128xi1>, vector<8x128xf32>
    %c3_217 = arith.constant 3 : index
    %c8_218 = arith.constant 8 : index
    %c0_219 = arith.constant 0 : index
    %443 = vector.load %arg7[%c3_217, %c8_218, %c0_219] : memref<10x16x128xf32, #tpu.memory_space<vmem>>, vector<1x8x128xf32>
    %444 = vector.shape_cast %443 : vector<1x8x128xf32> to vector<8x128xf32>
    %445 = vector.shape_cast %442 : vector<8x128xf32> to vector<1x8x128xf32>
    tpu.vector_store %arg7[%c3_217, %c8_218, %c0_219], %445 {strides = array<i32>} : memref<10x16x128xf32, #tpu.memory_space<vmem>>, vector<1x8x128xf32>,
    %cst_220 = arith.constant 0x7F800000 : f32
    %446 = vector.broadcast %cst_220 : f32 to vector<8x128xf32>
    %447 = arith.cmpf olt, %287#4, %446 : vector<8x128xf32>
    %cst_221 = arith.constant -1.000000e+00 : f32
    %448 = vector.broadcast %cst_221 : f32 to vector<8x128xf32>
    %449 = arith.select %447, %287#4, %448 : vector<8x128xi1>, vector<8x128xf32>
    %c4_222 = arith.constant 4 : index
    %c8_223 = arith.constant 8 : index
    %c0_224 = arith.constant 0 : index
    %450 = vector.load %arg7[%c4_222, %c8_223, %c0_224] : memref<10x16x128xf32, #tpu.memory_space<vmem>>, vector<1x8x128xf32>
    %451 = vector.shape_cast %450 : vector<1x8x128xf32> to vector<8x128xf32>
    %452 = vector.shape_cast %449 : vector<8x128xf32> to vector<1x8x128xf32>
    tpu.vector_store %arg7[%c4_222, %c8_223, %c0_224], %452 {strides = array<i32>} : memref<10x16x128xf32, #tpu.memory_space<vmem>>, vector<1x8x128xf32>,
    %cst_225 = arith.constant 0x7F800000 : f32
    %453 = vector.broadcast %cst_225 : f32 to vector<8x128xf32>
    %454 = arith.cmpf olt, %287#5, %453 : vector<8x128xf32>
    %cst_226 = arith.constant -1.000000e+00 : f32
    %455 = vector.broadcast %cst_226 : f32 to vector<8x128xf32>
    %456 = arith.select %454, %287#5, %455 : vector<8x128xi1>, vector<8x128xf32>
    %c5_227 = arith.constant 5 : index
    %c8_228 = arith.constant 8 : index
    %c0_229 = arith.constant 0 : index
    %457 = vector.load %arg7[%c5_227, %c8_228, %c0_229] : memref<10x16x128xf32, #tpu.memory_space<vmem>>, vector<1x8x128xf32>
    %458 = vector.shape_cast %457 : vector<1x8x128xf32> to vector<8x128xf32>
    %459 = vector.shape_cast %456 : vector<8x128xf32> to vector<1x8x128xf32>
    tpu.vector_store %arg7[%c5_227, %c8_228, %c0_229], %459 {strides = array<i32>} : memref<10x16x128xf32, #tpu.memory_space<vmem>>, vector<1x8x128xf32>,
    %cst_230 = arith.constant 0x7F800000 : f32
    %460 = vector.broadcast %cst_230 : f32 to vector<8x128xf32>
    %461 = arith.cmpf olt, %287#6, %460 : vector<8x128xf32>
    %cst_231 = arith.constant -1.000000e+00 : f32
    %462 = vector.broadcast %cst_231 : f32 to vector<8x128xf32>
    %463 = arith.select %461, %287#6, %462 : vector<8x128xi1>, vector<8x128xf32>
    %c6_232 = arith.constant 6 : index
    %c8_233 = arith.constant 8 : index
    %c0_234 = arith.constant 0 : index
    %464 = vector.load %arg7[%c6_232, %c8_233, %c0_234] : memref<10x16x128xf32, #tpu.memory_space<vmem>>, vector<1x8x128xf32>
    %465 = vector.shape_cast %464 : vector<1x8x128xf32> to vector<8x128xf32>
    %466 = vector.shape_cast %463 : vector<8x128xf32> to vector<1x8x128xf32>
    tpu.vector_store %arg7[%c6_232, %c8_233, %c0_234], %466 {strides = array<i32>} : memref<10x16x128xf32, #tpu.memory_space<vmem>>, vector<1x8x128xf32>,
    %cst_235 = arith.constant 0x7F800000 : f32
    %467 = vector.broadcast %cst_235 : f32 to vector<8x128xf32>
    %468 = arith.cmpf olt, %287#7, %467 : vector<8x128xf32>
    %cst_236 = arith.constant -1.000000e+00 : f32
    %469 = vector.broadcast %cst_236 : f32 to vector<8x128xf32>
    %470 = arith.select %468, %287#7, %469 : vector<8x128xi1>, vector<8x128xf32>
    %c7_237 = arith.constant 7 : index
    %c8_238 = arith.constant 8 : index
    %c0_239 = arith.constant 0 : index
    %471 = vector.load %arg7[%c7_237, %c8_238, %c0_239] : memref<10x16x128xf32, #tpu.memory_space<vmem>>, vector<1x8x128xf32>
    %472 = vector.shape_cast %471 : vector<1x8x128xf32> to vector<8x128xf32>
    %473 = vector.shape_cast %470 : vector<8x128xf32> to vector<1x8x128xf32>
    tpu.vector_store %arg7[%c7_237, %c8_238, %c0_239], %473 {strides = array<i32>} : memref<10x16x128xf32, #tpu.memory_space<vmem>>, vector<1x8x128xf32>,
    %cst_240 = arith.constant 0x7F800000 : f32
    %474 = vector.broadcast %cst_240 : f32 to vector<8x128xf32>
    %475 = arith.cmpf olt, %287#8, %474 : vector<8x128xf32>
    %cst_241 = arith.constant -1.000000e+00 : f32
    %476 = vector.broadcast %cst_241 : f32 to vector<8x128xf32>
    %477 = arith.select %475, %287#8, %476 : vector<8x128xi1>, vector<8x128xf32>
    %c8_242 = arith.constant 8 : index
    %c8_243 = arith.constant 8 : index
    %c0_244 = arith.constant 0 : index
    %478 = vector.load %arg7[%c8_242, %c8_243, %c0_244] : memref<10x16x128xf32, #tpu.memory_space<vmem>>, vector<1x8x128xf32>
    %479 = vector.shape_cast %478 : vector<1x8x128xf32> to vector<8x128xf32>
    %480 = vector.shape_cast %477 : vector<8x128xf32> to vector<1x8x128xf32>
    tpu.vector_store %arg7[%c8_242, %c8_243, %c0_244], %480 {strides = array<i32>} : memref<10x16x128xf32, #tpu.memory_space<vmem>>, vector<1x8x128xf32>,
    %cst_245 = arith.constant 0x7F800000 : f32
    %481 = vector.broadcast %cst_245 : f32 to vector<8x128xf32>
    %482 = arith.cmpf olt, %287#9, %481 : vector<8x128xf32>
    %cst_246 = arith.constant -1.000000e+00 : f32
    %483 = vector.broadcast %cst_246 : f32 to vector<8x128xf32>
    %484 = arith.select %482, %287#9, %483 : vector<8x128xi1>, vector<8x128xf32>
    %c9_247 = arith.constant 9 : index
    %c8_248 = arith.constant 8 : index
    %c0_249 = arith.constant 0 : index
    %485 = vector.load %arg7[%c9_247, %c8_248, %c0_249] : memref<10x16x128xf32, #tpu.memory_space<vmem>>, vector<1x8x128xf32>
    %486 = vector.shape_cast %485 : vector<1x8x128xf32> to vector<8x128xf32>
    %487 = vector.shape_cast %484 : vector<8x128xf32> to vector<1x8x128xf32>
    tpu.vector_store %arg7[%c9_247, %c8_248, %c0_249], %487 {strides = array<i32>} : memref<10x16x128xf32, #tpu.memory_space<vmem>>, vector<1x8x128xf32>,
    return
  }
  func.func @transform_0(%arg0: i32, %arg1: memref<8xi32, #tpu.memory_space<smem>>, %arg2: memref<8xi32, #tpu.memory_space<smem>>) -> i32 {
    %c0_i32 = arith.constant 0 : i32
    %c0_i32_0 = arith.constant 0 : i32
    return %c0_i32 : i32
  }
  func.func @transform_1(%arg0: i32, %arg1: memref<8xi32, #tpu.memory_space<smem>>, %arg2: memref<8xi32, #tpu.memory_space<smem>>) -> i32 {
    %c0_i32 = arith.constant 0 : i32
    %c0_i32_0 = arith.constant 0 : i32
    return %c0_i32 : i32
  }
  func.func @transform_2(%arg0: i32, %arg1: memref<8xi32, #tpu.memory_space<smem>>, %arg2: memref<8xi32, #tpu.memory_space<smem>>) -> i32 {
    %c0_i32 = arith.constant 0 : i32
    %c0_i32_0 = arith.constant 0 : i32
    return %c0_i32 : i32
  }
  func.func @transform_3(%arg0: i32, %arg1: memref<8xi32, #tpu.memory_space<smem>>, %arg2: memref<8xi32, #tpu.memory_space<smem>>) -> (i32, i32) {
    %c0_i32 = arith.constant 0 : i32
    %c0_i32_0 = arith.constant 0 : i32
    return %arg0, %c0_i32 : i32, i32
  }
  func.func @transform_4(%arg0: i32, %arg1: memref<8xi32, #tpu.memory_space<smem>>, %arg2: memref<8xi32, #tpu.memory_space<smem>>) -> (i32, i32, i32) {
    %c0_i32 = arith.constant 0 : i32
    %c0_i32_0 = arith.constant 0 : i32
    %c0_i32_1 = arith.constant 0 : i32
    return %c0_i32, %arg0, %c0_i32_0 : i32, i32, i32
  }
}

</mosaic_0001>

<bundles_post_ra>
// kernel: custom-call.3
= control target key start
LH: loop header
LB: loop body
LE: loop exit
PB: predicated region body
PF: predicated region fallthrough
CT: control target
= control target key end

     0   :  { %s6_s0 = inlined_call_operand.vmem [shape: u32[8], index: 0, kind: output, shape index: {}]  }

// kernel: pcd_render.1
= control target key start
LH: loop header
LB: loop body
LE: loop exit
PB: predicated region body
PF: predicated region fallthrough
CT: control target
= control target key end

     0   :  { %s2630_s27 = smov [#allocation3]   ;;  %s2631_s28 = smov [#allocation4]   ;;  %s3848_s0 = inlined_call_operand.vmem [shape: s32[8], index: 0, kind: input, shape index: {}]   ;;  %s3849_s2 = inlined_call_operand.vmem [shape: f32[2050], index: 2, kind: input, shape index: {}]   ;;  %s3850_s3 = inlined_call_operand.vmem [shape: f32[2050], index: 3, kind: input, shape index: {}]   ;;  %s3851_s4 = inlined_call_operand.vmem [shape: f32[2050], index: 4, kind: input, shape index: {}]   ;;  %s3852_s5 = inlined_call_operand.vmem [shape: f32[64,128], index: 5, kind: output, shape index: {0}]   ;;  %s3853_s6 = inlined_call_operand.hbm [shape: f32[10,64,128], index: 6, kind: output, shape index: {1}]   ;;  %s3854_s1 = inlined_call_operand.vmem [shape: s32[8], index: 1, kind: input, shape index: {}]  }
   0x1   :  { %s13_s23 = sshll.u32 %s3848_s0, 4  ;;  %s18_s26 = sshll.u32 %s3854_s1, 4  ;;  %s14_s23 = int_to_ptr.vmem [resolvable:$true] %s13_s23  ;;  %s19_s26 = int_to_ptr.vmem [resolvable:$true] %s18_s26 }
   0x2   :  { %16 = dma.vmem_to_smem %s14_s23, 16, %s2630_s27, [#allocation2] }
   0x3   :  { %21 = dma.vmem_to_smem %s19_s26, 16, %s2631_s28, [#allocation2] }
   0x4   :  { %2272 = dma.done.wait [#allocation2], 32 }
   0x5   :  { %2273 = vsyncadd [#allocation2], 4294967264 }
   0x6   :  { %24 = sfence }
   0x7   :  { %25 = vsyncpa [#allocation7], 0 }
   0x8   :  { %26 = vsyncpa [#allocation9], 0 }
   0x9   :  { %27 = vsyncpa [#allocation6], 0 }
   0xa   :  { %29 = vsyncpa [#allocation6 + $0x1], 0  ;;  %s2684_s29 = smov 0   ;;  %s2686_s0 = smov 0  }
   0xb   :  { %s2688_s30 = smov 0   ;;  %s2690_s1 = smov 0  }
   0xc LB: > { %s2705_s7 = sadd.s32 4294967295, %s2300_s1   ;;  %s1070_s8 = sadd.s32 4294967294, %s2300_s1   ;;  %s2300_s1 = sphi %s2690_s1, %s3951_s1   ;;  %s2296_s30 = sphi %s2688_s30, %s3950_s30   ;;  %s2292_s0 = sphi %s2686_s0, %s3949_s0   ;;  %s2288_s29 = sphi %s2684_s29, %s3948_s29  }
   0xd   : > { %s2709_s9 = sadd.s32 1, %s2300_s1   ;;  %s131_s10 = sadd.s32 1, %s2296_s30 }
   0xe   : > { %s128_s11 = ssub.s32 %s2300_s1, %s2709_s9  ;;  %p141_p0 = scmp.ne.s32.totalorder %s2296_s30, %s2292_s0 }
   0xf   : > { %p129_p1 = scmp.eq.s32.totalorder %s128_s11, 0  ;;  %p142_p2 = scmp.eq.s32.totalorder %s2705_s7, 3 }
  0x10   : > { %p147_p3 = scmp.ne.s32.totalorder %s2292_s0, %s2288_s29  ;;  %p148_p4 = scmp.eq.s32.totalorder %s1070_s8, 3 }
  0x11   : > { %s2720_s12 = scalar_select %p129_p1, %s2296_s30, %s131_s10  }
  0x12   : > { %p2722_p5 = por %p142_p2, %p141_p0  ;;  %p2726_p6 = por %p148_p4, %p147_p3 }
  0x13   : > { %p1071_p7 = scmp.ge.s32.totalorder %s2300_s1, 1  ;;  %p155_p8 = scmp.lt.s32.totalorder %s2300_s1, 5 }
  0x14   : > { %p1149_p9 = scmp.eq.s32.totalorder %s2705_s7, 0  ;;  %s177_s18 = sshll.u32 %s3850_s3, 4  ;;  %s178_s18 = int_to_ptr.vmem [resolvable:$true] %s177_s18 }
  0x15   : > { %p2733_p10 = pnand %p1071_p7, %p155_p8  ;;  %s167_s21 = sshll.u32 %s3849_s2, 4  ;;  %s168_s21 = int_to_ptr.vmem [resolvable:$true] %s167_s21 }
  0x16   : > { %s187_s24 = sshll.u32 %s3851_s4, 4  ;;  %s2632_s25 = smov [#allocation8]   ;;  %s188_s24 = int_to_ptr.vmem [resolvable:$true] %s187_s24 }
  0x17   : > { %p1135_p11 = pneg %p2733_p10  ;;  %s2633_s26 = smov [#allocation5]  }
  0x18   : > { %s2634_s27 = smov [#allocation10]  }
  0x19   : > { %p1136_p12 = pnand %p1149_p9, %p1135_p11  ;;  %200 = sbr.rel (%p2733_p10) target bundleno = 238 (0xee), region = 32 }
  0x1b   : > { %1141 = dma.vmem_to_smem (!%p1136_p12), %s178_s18, 272, %s2632_s25, [#allocation9]  }
  0x1c   : > { %1138 = dma.vmem_to_smem (!%p1136_p12), %s168_s21, 272, %s2633_s26, [#allocation7]  }
  0x1d   : > { %1144 = dma.vmem_to_smem (!%p1136_p12), %s188_s24, 272, %s2634_s27, [#allocation9]  }
  0x1e   : > { %2275 = dma.done.wait (%p1149_p9), [#allocation7], 272  }
  0x1f   : > { %2277 = vsyncadd (%p1149_p9), [#allocation7], 4294967024 }
  0x20   : > { %2279 = dma.done.wait (%p1149_p9), [#allocation9], 544  }
  0x21   : > { %2281 = vsyncadd (%p1149_p9), [#allocation9], 4294966752 }
  0x22   : > { %217 = sfence }
  0x23   : > { %s235_s28 = sand.u32 1, %s2292_s0   ;;  %s2762_s8 = sshll.u32 %s2705_s7, 1  ;;  %v245_v0 = vlaneseq  ;;  %v2635_v1 = vmov 64.0   ;;  %v2799_v20 = vmov 0.0   ;;  %v2801_v21 = vmov 0.0  }
  0x24   : > { %s1114_s10 = smul.u32 160, %s235_s28  ;;  %p239_p13 = scmp.lt.s32.totalorder %s2762_s8, 7  ;;  %1857 = vrcp.f32 %v2635_v1  ;;  %v2803_v22 = vmov 0.0   ;;  %v2805_v23 = vmov 0.0   ;;  %v2807_v24 = vmov 0.0  }
  0x25   : > { %v246_v2 = vand.u32 127, %v245_v0  ;;  %v2767_v3 = vshrl.u32 %v245_v0, 7  ;;  %s2770_s11 = sshll.u32 %s2705_s7, 4  ;;  %s2773_s15 = sld [smem:[#allocation3 + %s2762_s8]]  ;;  %v2809_v25 = vmov 0.0   ;;  %v2811_v26 = vmov 0.0  }
  0x26   : > { %s263_s16 = scvt.s32.f32 %s2770_s11  ;;  %s2779_s18 = sld [smem:[#allocation4 + %s2762_s8]]  ;;  %v2813_v27 = vmov 0.0   ;;  %v2815_v28 = vmov 0.0   ;;  %v2817_v29 = vmov 0.0   ;;  %v2819_v30 = vmov inf  }
  0x27   : > { %s240_s17 = scalar_select %p239_p13, %s2762_s8, 7  ;;  %v250_v4 = vcvt.s32.f32 %v2767_v3  ;;  %v247_v5 = vcvt.s32.f32 %v246_v2  ;;  %v2821_v31 = vmov inf   ;;  %v2823_v32 = vmov inf  }
  0x28   : > { %v264_v6 = vstv %s263_s16  ;;  %s2796_s22 = scalar_lea.vmem [#allocation11], %s1114_s10  ;;  %v2825_v33 = vmov inf   ;;  %v2827_v34 = vmov inf   ;;  %v2829_v35 = vmov inf  }
  0x29   : > { %s1080_s19 = sshll.u32 %s240_s17, 3  ;;  %v265_v7 = vadd.f32 %v264_v6, %v250_v4  ;;  %v251_v10 = vmul.f32 2.0, %v247_v5  ;;  %v2831_v36 = vmov inf   ;;  %v2833_v37 = vmov inf  }
  0x2a   : > { %v1858_v8 = vpop.eup %1857  ;;  %s2786_s7 = scalar_lea.vmem %s3852_s5, %s1080_s19  ;;  %v2835_v38 = vmov inf   ;;  %v2837_v39 = vmov inf  }
  0x2b   : > { %v254_v9 = vmul.f32 64.0, %v1858_v8  ;;  %v266_v11 = vmul.f32 2.0, %v265_v7  ;;  %v252_v14 = vsub.f32 127.0, %v251_v10  ;;  %vm258_vm0 = vweird.f32 %v1858_v8 }
  0x2c   : > { %p1083_p0 = scmp.le.s32.totalorder %s2779_s18, 0 }
  0x2d   : > { %v255_v12 = vsub.f32 1.0, %v254_v9  ;;  %v267_v15 = vsub.f32 63.0, %v266_v11  ;;  %s2881_s23 = smov (!%p1083_p0), 0  }
  0x2f   : > { %v256_v13 = vmul.f32 %v1858_v8, %v255_v12 }
  0x30   : > { %911 = sbr.rel (%p1083_p0) target bundleno = 113 (0x71), region = 111 }
  0x31   : > { %v257_v16 = vadd.f32 %v1858_v8, %v256_v13 }
  0x33   : > { %v2788_v17 = vsel %vm258_vm0, %v1858_v8, %v257_v16 }
  0x34   : > { %v2791_v18 = vmul.f32 %v2788_v17, %v252_v14  ;;  %v2794_v19 = vmul.f32 %v267_v15, %v2788_v17 }
  0x35   : > { %v2841_v40 = vmov 0.0   ;;  %v2843_v41 = vmov 0.0   ;;  %v2845_v42 = vmov 0.0   ;;  %v2847_v43 = vmov 0.0  }
  0x36   : > { %v2849_v44 = vmov 0.0   ;;  %v2851_v45 = vmov 0.0   ;;  %v2853_v46 = vmov 0.0   ;;  %v2855_v47 = vmov 0.0  }
  0x37   : > { %v2857_v48 = vmov 0.0   ;;  %v2859_v49 = vmov 0.0   ;;  %v2861_v50 = vmov inf   ;;  %v2863_v51 = vmov inf  }
  0x38   : > { %v2865_v52 = vmov inf   ;;  %v2867_v53 = vmov inf   ;;  %v2869_v54 = vmov inf   ;;  %v2871_v55 = vmov inf  }
  0x39   : > { %v2873_v56 = vmov inf   ;;  %v2875_v57 = vmov inf   ;;  %v2877_v58 = vmov inf   ;;  %v2879_v59 = vmov inf  }
  0x3a LB: >> { %s1084_s24 = sshll.u32 %s2384_s23, 1  ;;  %s274_s23 = sadd.s32 1, %s2384_s23   ;;  %s2384_s23 = sphi %s2881_s23, %s274_s23   ;;  %v2380_v59 = vphi %v2879_v59, %v3889_v59   ;;  %v2376_v58 = vphi %v2877_v58, %v3888_v58   ;;  %v2372_v57 = vphi %v2875_v57, %v3887_v57   ;;  %v2368_v56 = vphi %v2873_v56, %v3886_v56   ;;  %v2364_v55 = vphi %v2871_v55, %v3885_v55   ;;  %v2360_v54 = vphi %v2869_v54, %v3884_v54   ;;  %v2356_v53 = vphi %v2867_v53, %v3883_v53   ;;  %v2352_v52 = vphi %v2865_v52, %v3882_v52   ;;  %v2348_v51 = vphi %v2863_v51, %v3881_v51   ;;  %v2344_v50 = vphi %v2861_v50, %v3880_v50   ;;  %v2340_v49 = vphi %v2859_v49, %v3879_v49   ;;  %v2336_v48 = vphi %v2857_v48, %v3878_v48   ;;  %v2332_v47 = vphi %v2855_v47, %v3877_v47   ;;  %v2328_v46 = vphi %v2853_v46, %v3876_v46   ;;  %v2324_v45 = vphi %v2851_v45, %v3875_v45   ;;  %v2320_v44 = vphi %v2849_v44, %v3874_v44   ;;  %v2316_v43 = vphi %v2847_v43, %v3873_v43   ;;  %v2312_v42 = vphi %v2845_v42, %v3872_v42   ;;  %v2308_v41 = vphi %v2843_v41, %v3871_v41   ;;  %v2304_v40 = vphi %v2841_v40, %v3870_v40  }
  0x3b   : >> { %s298_s25 = sadd.s32 %s1084_s24, %s2773_s15  ;;  %p3082_p1 = scmp.ge.s32.totalorder %s274_s23, %s2779_s18 }
  0x3c   : >> { %s299_s26 = sld [smem:[#allocation5 + %s298_s25]]  ;;  %s360_s27 = sadd.s32 1, %s298_s25 }
  0x3d   : >> { %s300_s10 = sld [smem:[#allocation8 + %s298_s25]] }
  0x3e   : >> { %s301_s16 = sld [smem:[#allocation10 + %s298_s25]] }
  0x3f   : >> { %s361_s17 = sld [smem:[#allocation5 + %s360_s27]] }
  0x40   : >> { %s362_s19 = sld [smem:[#allocation8 + %s360_s27]] }
  0x41   : >> { %s363_s20 = sld [smem:[#allocation10 + %s360_s27]] }
  0x42   : >> { %v302_v60 = vstv %s299_s26 }
  0x43   : >> { %v303_v61 = vsub.f32 %v2791_v18, %v302_v60  ;;  %v304_v62 = vstv %s300_s10 }
  0x44   : >> { %v305_v63 = vsub.f32 %v2794_v19, %v304_v62  ;;  %v310_v9 = vstv %s301_s16 }
  0x45   : >> { %v306_v0 = vmul.f32 %v303_v61, %v303_v61  ;;  %v364_v1 = vstv %s361_s17 }
  0x46   : >> { %v307_v2 = vmul.f32 %v305_v63, %v305_v63  ;;  %v365_v5 = vsub.f32 %v2791_v18, %v364_v1  ;;  %v366_v6 = vstv %s362_s19 }
  0x47   : >> { %v367_v7 = vsub.f32 %v2794_v19, %v366_v6  ;;  %v372_v16 = vstv %s363_s20 }
  0x48   : >> { %v308_v8 = vadd.f32 %v307_v2, %v306_v0  ;;  %v368_v10 = vmul.f32 %v365_v5, %v365_v5 }
  0x49   : >> { %v369_v11 = vmul.f32 %v367_v7, %v367_v7 }
  0x4a   : >> { %vm309_vm1 = vcmp.lt.f32.partialorder %v308_v8, 2.5e-05 }
  0x4b   : >> { %v311_v12 = vsel %vm309_vm1, %v310_v9, inf  ;;  %v370_v13 = vadd.f32 %v369_v11, %v368_v10 }
  0x4c   : >> { %vm312_vm2 = vcmp.lt.f32.partialorder %v311_v12, %v2380_v59 }
  0x4d   : >> { %v315_v14 = vsel %vm312_vm2, %v2380_v59, %v311_v12  ;;  %v316_v15 = vsel %vm312_vm2, %v2340_v49, %v308_v8  ;;  %vm371_vm4 = vcmp.lt.f32.partialorder %v370_v13, 2.5e-05  ;;  %v313_v20 = vsel %vm312_vm2, %v311_v12, %v2380_v59 }
  0x4e   : >> { %vm317_vm3 = vcmp.lt.f32.partialorder %v315_v14, %v2376_v58  ;;  %v373_v23 = vsel %vm371_vm4, %v372_v16, inf  ;;  %v314_v26 = vsel %vm312_vm2, %v308_v8, %v2340_v49 }
  0x4f   : >> { %v320_v21 = vsel %vm317_vm3, %v2376_v58, %v315_v14  ;;  %v321_v22 = vsel %vm317_vm3, %v2336_v48, %v316_v15  ;;  %vm374_vm7 = vcmp.lt.f32.partialorder %v373_v23, %v313_v20  ;;  %v318_v27 = vsel %vm317_vm3, %v315_v14, %v2376_v58 }
  0x50   : >> { %vm322_vm5 = vcmp.lt.f32.partialorder %v320_v21, %v2372_v57  ;;  %v2966_v59 = vsel %vm374_vm7, %v373_v23, %v313_v20   ;;  %v2969_v49 = vsel %vm374_vm7, %v370_v13, %v314_v26   ;;  %v377_v31 = vsel %vm374_vm7, %v313_v20, %v373_v23 }
  0x51   : >> { %v325_v24 = vsel %vm322_vm5, %v2372_v57, %v320_v21  ;;  %v326_v25 = vsel %vm322_vm5, %v2332_v47, %v321_v22  ;;  %v3858_v39 = vmov %v2966_v59  ;;  %v3859_v30 = vmov %v2969_v49 }
  0x52   : >> { %vm327_vm6 = vcmp.lt.f32.partialorder %v325_v24, %v2368_v56  ;;  %v319_v33 = vsel %vm317_vm3, %v316_v15, %v2336_v48  ;;  %vm379_vm10 = vcmp.lt.f32.partialorder %v377_v31, %v318_v27  ;;  %v323_v34 = vsel %vm322_vm5, %v320_v21, %v2372_v57 }
  0x53   : >> { %v330_v28 = vsel %vm327_vm6, %v2368_v56, %v325_v24  ;;  %v331_v29 = vsel %vm327_vm6, %v2328_v46, %v326_v25  ;;  %v378_v37 = vsel %vm374_vm7, %v314_v26, %v370_v13  ;;  %v2990_v58 = vsel %vm379_vm10, %v377_v31, %v318_v27  }
  0x54   : >> { %vm332_vm8 = vcmp.lt.f32.partialorder %v330_v28, %v2364_v55  ;;  %v3860_v38 = vmov %v2990_v58  ;;  %v2993_v48 = vsel %vm379_vm10, %v378_v37, %v319_v33   ;;  %v382_v49 = vsel %vm379_vm10, %v318_v27, %v377_v31 }
  0x55   : >> { %v335_v32 = vsel %vm332_vm8, %v2364_v55, %v330_v28  ;;  %v336_v35 = vsel %vm332_vm8, %v2324_v45, %v331_v29  ;;  %v3861_v60 = vmov %v2993_v48  ;;  %v324_v61 = vsel %vm322_vm5, %v321_v22, %v2332_v47 }
  0x56   : >> { %vm337_vm9 = vcmp.lt.f32.partialorder %v335_v32, %v2360_v54  ;;  %vm384_vm13 = vcmp.lt.f32.partialorder %v382_v49, %v323_v34  ;;  %v328_v58 = vsel %vm327_vm6, %v325_v24, %v2368_v56  ;;  %v383_v63 = vsel %vm379_vm10, %v319_v33, %v378_v37 }
  0x57   : >> { %v340_v36 = vsel %vm337_vm9, %v2360_v54, %v335_v32  ;;  %v341_v48 = vsel %vm337_vm9, %v2320_v44, %v336_v35  ;;  %v3013_v57 = vsel %vm384_vm13, %v382_v49, %v323_v34   ;;  %v3015_v47 = vsel %vm384_vm13, %v383_v63, %v324_v61  }
  0x58   : >> { %vm342_vm11 = vcmp.lt.f32.partialorder %v340_v36, %v2356_v53  ;;  %v3862_v0 = vmov %v3013_v57  ;;  %v3863_v1 = vmov %v3015_v47  ;;  %v387_v2 = vsel %vm384_vm13, %v323_v34, %v382_v49 }
  0x59   : >> { %v345_v59 = vsel %vm342_vm11, %v2356_v53, %v340_v36  ;;  %v329_v5 = vsel %vm327_vm6, %v326_v25, %v2328_v46  ;;  %v333_v6 = vsel %vm332_vm8, %v330_v28, %v2364_v55  ;;  %v346_v7 = vsel %vm342_vm11, %v2316_v43, %v341_v48 }
  0x5a   : >> { %vm347_vm12 = vcmp.lt.f32.partialorder %v345_v59, %v2352_v52  ;;  %v388_v8 = vsel %vm384_vm13, %v324_v61, %v383_v63  ;;  %vm389_vm15 = vcmp.lt.f32.partialorder %v387_v2, %v328_v58  ;;  %v334_v47 = vsel %vm332_vm8, %v331_v29, %v2324_v45 }
  0x5b   : >> { %v350_v62 = vsel %vm347_vm12, %v2352_v52, %v345_v59  ;;  %v3030_v56 = vsel %vm389_vm15, %v387_v2, %v328_v58   ;;  %v3032_v46 = vsel %vm389_vm15, %v388_v8, %v329_v5   ;;  %v338_v57 = vsel %vm337_vm9, %v335_v32, %v2360_v54 }
  0x5c   : >> { %vm352_vm14 = vcmp.lt.f32.partialorder %v350_v62, %v2348_v51  ;;  %v3864_v9 = vmov %v3030_v56  ;;  %v3865_v10 = vmov %v3032_v46  ;;  %v392_v12 = vsel %vm389_vm15, %v328_v58, %v387_v2 }
  0x5d   : >> { %v355_v11 = vsel %vm352_vm14, %v2348_v51, %v350_v62  ;;  %v393_v13 = vsel %vm389_vm15, %v329_v5, %v388_v8  ;;  %v339_v14 = vsel %vm337_vm9, %v336_v35, %v2320_v44  ;;  %v343_v45 = vsel %vm342_vm11, %v340_v36, %v2356_v53 }
  0x5e   : >> { %v351_v46 = vsel %vm347_vm12, %v2312_v42, %v346_v7  ;;  %vm394_vm0 = vcmp.lt.f32.partialorder %v392_v12, %v333_v6  ;;  %v344_v54 = vsel %vm342_vm11, %v341_v48, %v2316_v43  ;;  %v348_v44 = vsel %vm347_vm12, %v345_v59, %v2352_v52 }
  0x5f   : >> { %v3049_v55 = vsel %vm394_vm0, %v392_v12, %v333_v6   ;;  %v3051_v56 = vsel %vm394_vm0, %v393_v13, %v334_v47   ;;  %v397_v20 = vsel %vm394_vm0, %v333_v6, %v392_v12  ;;  %v398_v21 = vsel %vm394_vm0, %v334_v47, %v393_v13 }
  0x60   : >> { %v3866_v15 = vmov %v3049_v55  ;;  %v3867_v16 = vmov %v3051_v56  ;;  %vm357_vm1 = vcmp.lt.f32.partialorder %v355_v11, %v2344_v50  ;;  %vm399_vm2 = vcmp.lt.f32.partialorder %v397_v20, %v338_v57 }
  0x61   : >> { %v3060_v22 = vsel %vm399_vm2, %v397_v20, %v338_v57   ;;  %v401_v24 = vsel %vm399_vm2, %v398_v21, %v339_v14   ;;  %v402_v23 = vsel %vm399_vm2, %v338_v57, %v397_v20  ;;  %v403_v55 = vsel %vm399_vm2, %v339_v14, %v398_v21 }
  0x62   : >> { %v3868_v34 = vmov %v3060_v22  ;;  %v349_v25 = vsel %vm347_vm12, %v346_v7, %v2312_v42  ;;  %v353_v43 = vsel %vm352_vm14, %v350_v62, %v2348_v51  ;;  %v356_v53 = vsel %vm352_vm14, %v2308_v41, %v351_v46 }
  0x63   : >> { %vm404_vm3 = vcmp.lt.f32.partialorder %v402_v23, %v343_v45  ;;  %v354_v29 = vsel %vm352_vm14, %v351_v46, %v2308_v41  ;;  %v358_v42 = vsel %vm357_vm1, %v355_v11, %v2344_v50  ;;  %v359_v36 = vsel %vm357_vm1, %v356_v53, %v2304_v40 }
  0x64   : >> { %v405_v33 = vsel %vm404_vm3, %v402_v23, %v343_v45   ;;  %v406_v26 = vsel %vm404_vm3, %v403_v55, %v344_v54   ;;  %v407_v27 = vsel %vm404_vm3, %v343_v45, %v402_v23  ;;  %v408_v28 = vsel %vm404_vm3, %v344_v54, %v403_v55 }
  0x65   : >> { %vm409_vm4 = vcmp.lt.f32.partialorder %v407_v27, %v348_v44  ;;  %v3875_v45 = vmov %v3867_v16  ;;  %v3876_v46 = vmov %v3865_v10  ;;  %v3877_v47 = vmov %v3863_v1 }
  0x66   : >> { %v410_v32 = vsel %vm409_vm4, %v407_v27, %v348_v44   ;;  %v411_v31 = vsel %vm409_vm4, %v408_v28, %v349_v25   ;;  %v412_v52 = vsel %vm409_vm4, %v348_v44, %v407_v27  ;;  %v413_v35 = vsel %vm409_vm4, %v349_v25, %v408_v28 }
  0x67   : >> { %vm414_vm5 = vcmp.lt.f32.partialorder %v412_v52, %v353_v43  ;;  %v3874_v44 = vmov %v401_v24  ;;  %v3878_v48 = vmov %v3861_v60  ;;  %v3883_v53 = vmov %v405_v33 }
  0x68   : >> { %v415_v37 = vsel %vm414_vm5, %v412_v52, %v353_v43   ;;  %v416_v61 = vsel %vm414_vm5, %v413_v35, %v354_v29   ;;  %v417_v49 = vsel %vm414_vm5, %v353_v43, %v412_v52  ;;  %v418_v59 = vsel %vm414_vm5, %v354_v29, %v413_v35 }
  0x69   : >> { %vm419_vm6 = vcmp.lt.f32.partialorder %v417_v49, %v358_v42  ;;  %v3871_v41 = vmov %v416_v61  ;;  %v3873_v43 = vmov %v406_v26  ;;  %v3881_v51 = vmov %v415_v37  ;;  %276 = sbr.rel (!%p3082_p1) target bundleno = 58 (0x3a), region = 117 }
  0x6a   : >> { %v420_v62 = vsel %vm419_vm6, %v417_v49, %v358_v42   ;;  %v421_v63 = vsel %vm419_vm6, %v418_v59, %v359_v36   ;;  %v3872_v42 = vmov %v411_v31  ;;  %v3879_v49 = vmov %v3859_v30 }
  0x6b   : >> { %v3870_v40 = vmov %v421_v63  ;;  %v3880_v50 = vmov %v420_v62  ;;  %v3882_v52 = vmov %v410_v32  ;;  %v3884_v54 = vmov %v3868_v34 }
  0x6c   : >> { %v3885_v55 = vmov %v3866_v15  ;;  %v3886_v56 = vmov %v3864_v9  ;;  %v3887_v57 = vmov %v3862_v0  ;;  %v3888_v58 = vmov %v3860_v38 }
  0x6d   : >> { %v3889_v59 = vmov %v3858_v39  ;;  %v3890_v20 = vmov (%p3082_p1), %v421_v63  ;;  %v3891_v21 = vmov (%p3082_p1), %v416_v61  ;;  %v3892_v22 = vmov (%p3082_p1), %v411_v31 }
  0x6e   : > { %v3893_v23 = vmov %v406_v26  ;;  %v3894_v25 = vmov %v3867_v16  ;;  %v3895_v26 = vmov %v3865_v10  ;;  %v3896_v27 = vmov %v3863_v1 }
  0x6f   : > { %v3897_v28 = vmov %v3861_v60  ;;  %v3898_v29 = vmov %v3859_v30  ;;  %v3899_v30 = vmov %v420_v62  ;;  %v3900_v31 = vmov %v415_v37 }
  0x70   : > { %v3901_v35 = vmov %v3866_v15  ;;  %v3902_v36 = vmov %v3864_v9  ;;  %v3903_v37 = vmov %v3862_v0 }
  0x71 PF: > { %vm422_vm7 = vcmp.lt.f32.partialorder %v2464_v39, inf  ;;  %v423_v19 = vmul.f32 40000.0, %v2424_v29  ;;  %v429_v40 = vmul.f32 40000.0, %v2420_v28  ;;  %s528_s15 = sadd.s32 1, %s2762_s8  ;;  %vm428_vm8 = vcmp.lt.f32.partialorder %v2460_v38, inf  ;;  %s1111_s8 = sadd.s32 8, %s2770_s11  ;;  %v2464_v39 = vphi %v2837_v39, %v3858_v39   ;;  %v2460_v38 = vphi %v2835_v38, %v3860_v38   ;;  %v2456_v37 = vphi %v2833_v37, %v3903_v37   ;;  %v2452_v36 = vphi %v2831_v36, %v3902_v36   ;;  %v2448_v35 = vphi %v2829_v35, %v3901_v35   ;;  %v2444_v34 = vphi %v2827_v34, %v3868_v34   ;;  %v2440_v33 = vphi %v2825_v33, %v405_v33   ;;  %v2436_v32 = vphi %v2823_v32, %v410_v32   ;;  %v2432_v31 = vphi %v2821_v31, %v3900_v31   ;;  %v2428_v30 = vphi %v2819_v30, %v3899_v30   ;;  %v2424_v29 = vphi %v2817_v29, %v3898_v29   ;;  %v2420_v28 = vphi %v2815_v28, %v3897_v28   ;;  %v2416_v27 = vphi %v2813_v27, %v3896_v27   ;;  %v2412_v26 = vphi %v2811_v26, %v3895_v26   ;;  %v2408_v25 = vphi %v2809_v25, %v3894_v25   ;;  %v2404_v24 = vphi %v2807_v24, %v401_v24   ;;  %v2400_v23 = vphi %v2805_v23, %v3893_v23   ;;  %v2396_v22 = vphi %v2803_v22, %v3892_v22   ;;  %v2392_v21 = vphi %v2801_v21, %v3891_v21   ;;  %v2388_v20 = vphi %v2799_v20, %v3890_v20  }
  0x72   : > { %vm436_vm9 = vcmp.lt.f32.partialorder %v2456_v37, inf  ;;  %v437_v41 = vmul.f32 40000.0, %v2416_v27  ;;  %v445_v50 = vmul.f32 40000.0, %v2412_v26  ;;  %s3237_s18 = sld [smem:[#allocation3 + %s528_s15]]  ;;  %vm444_vm10 = vcmp.lt.f32.partialorder %v2452_v36, inf  ;;  %s530_s24 = scvt.s32.f32 %s1111_s8 }
  0x73   : > { %v424_v51 = vsub.f32 1.0, %v423_v19  ;;  %v430_v60 = vsub.f32 1.0, %v429_v40  ;;  %v453_v58 = vmul.f32 40000.0, %v2408_v25  ;;  %s3240_s23 = sld [smem:[#allocation4 + %s528_s15]]  ;;  %vm452_vm11 = vcmp.lt.f32.partialorder %v2448_v35, inf }
  0x74   : > { %v438_v48 = vsub.f32 1.0, %v437_v41  ;;  %v446_v0 = vsub.f32 1.0, %v445_v50  ;;  %v461_v1 = vmul.f32 40000.0, %v2404_v24  ;;  %vm460_vm12 = vcmp.lt.f32.partialorder %v2444_v34, inf }
  0x75   : > { %v425_v2 = vsel %vm422_vm7, %v424_v51, 0.0  ;;  %v431_v5 = vsel %vm428_vm8, %v430_v60, 0.0  ;;  %v454_v6 = vsub.f32 1.0, %v453_v58  ;;  %vm468_vm13 = vcmp.lt.f32.partialorder %v2440_v33, inf }
  0x76   : > { %v427_v7 = vsub.f32 1.0, %v425_v2  ;;  %v434_v8 = vsub.f32 1.0, %v431_v5  ;;  %v439_v47 = vsel %vm436_vm9, %v438_v48, 0.0  ;;  %v447_v9 = vsel %vm444_vm10, %v446_v0, 0.0 }
  0x77   : > { %v442_v10 = vsub.f32 1.0, %v439_v47  ;;  %v455_v57 = vsel %vm452_vm11, %v454_v6, 0.0  ;;  %v462_v11 = vsub.f32 1.0, %v461_v1  ;;  %v450_v14 = vsub.f32 1.0, %v447_v9 }
  0x78   : > { %v432_v12 = vmul.f32 %v431_v5, %v427_v7  ;;  %v435_v13 = vmul.f32 %v434_v8, %v427_v7  ;;  %v469_v45 = vmul.f32 40000.0, %v2400_v23  ;;  %v458_v46 = vsub.f32 1.0, %v455_v57 }
  0x79   : > { %v463_v15 = vsel %vm460_vm12, %v462_v11, 0.0  ;;  %vm476_vm14 = vcmp.lt.f32.partialorder %v2436_v32, inf  ;;  %v477_v56 = vmul.f32 40000.0, %v2396_v22  ;;  %vm484_vm15 = vcmp.lt.f32.partialorder %v2432_v31, inf  ;;  %p1095_p2 = scmp.le.s32.totalorder %s3240_s23, 0 }
  0x7a   : > { %v433_v16 = vadd.f32 %v432_v12, %v425_v2  ;;  %v440_v54 = vmul.f32 %v439_v47, %v435_v13  ;;  %v443_v44 = vmul.f32 %v442_v10, %v435_v13  ;;  %v466_v24 = vsub.f32 1.0, %v463_v15  ;;  %s3397_s25 = smov (!%p1095_p2), 0  }
  0x7b   : > { %v470_v55 = vsub.f32 1.0, %v469_v45  ;;  %v478_v25 = vsub.f32 1.0, %v477_v56  ;;  %v485_v43 = vmul.f32 40000.0, %v2392_v21  ;;  %v493_v27 = vmul.f32 40000.0, %v2388_v20 }
  0x7c   : > { %v441_v23 = vadd.f32 %v440_v54, %v433_v16  ;;  %v448_v53 = vmul.f32 %v447_v9, %v443_v44  ;;  %v451_v26 = vmul.f32 %v450_v14, %v443_v44  ;;  %v499_v42 = vsel %vm422_vm7, %v2464_v39, -1.0 }
  0x7d   : > { %v471_v22 = vsel %vm468_vm13, %v470_v55, 0.0  ;;  %v479_v28 = vsel %vm476_vm14, %v478_v25, 0.0  ;;  %v486_v29 = vsub.f32 1.0, %v485_v43  ;;  %500 = vst [vmem:[%s2796_s22] sm:$0xff] %v499_v42  ;;  %vm492_vm0 = vcmp.lt.f32.partialorder %v2428_v30, inf }
  0x7e   : > { %v449_v52 = vadd.f32 %v448_v53, %v441_v23  ;;  %v456_v61 = vmul.f32 %v455_v57, %v451_v26  ;;  %v459_v49 = vmul.f32 %v458_v46, %v451_v26  ;;  %v474_v21 = vsub.f32 1.0, %v471_v22 }
  0x7f   : > { %v482_v59 = vsub.f32 1.0, %v479_v28  ;;  %v487_v20 = vsel %vm484_vm15, %v486_v29, 0.0  ;;  %v501_v62 = vsel %vm428_vm8, %v2460_v38, -1.0  ;;  %v494_v40 = vsub.f32 1.0, %v493_v27 }
  0x80   : > { %v457_v63 = vadd.f32 %v456_v61, %v449_v52  ;;  %v464_v39 = vmul.f32 %v463_v15, %v459_v49  ;;  %v467_v19 = vmul.f32 %v466_v24, %v459_v49  ;;  %1085 = vst [vmem:[%s2796_s22 + $0x10] sm:$0xff] %v501_v62  ;;  %v490_v41 = vsub.f32 1.0, %v487_v20 }
  0x81   : > { %v504_v50 = vsel %vm436_vm9, %v2456_v37, -1.0  ;;  %v507_v51 = vsel %vm444_vm10, %v2452_v36, -1.0  ;;  %v510_v38 = vsel %vm452_vm11, %v2448_v35, -1.0  ;;  %v513_v0 = vsel %vm460_vm12, %v2444_v34, -1.0 }
  0x82   : > { %v465_v60 = vadd.f32 %v464_v39, %v457_v63  ;;  %v472_v58 = vmul.f32 %v471_v22, %v467_v19  ;;  %v475_v48 = vmul.f32 %v474_v21, %v467_v19  ;;  %1086 = vst [vmem:[%s2796_s22 + $0x20] sm:$0xff] %v504_v50  ;;  %v516_v37 = vsel %vm468_vm13, %v2440_v33, -1.0 }
  0x83   : > { %1087 = vst [vmem:[%s2796_s22 + $0x30] sm:$0xff] %v507_v51  ;;  %v519_v36 = vsel %vm476_vm14, %v2436_v32, -1.0  ;;  %v531_v5 = vstv %s530_s24  ;;  %v495_v34 = vsel %vm492_vm0, %v494_v40, 0.0  ;;  %v522_v33 = vsel %vm484_vm15, %v2432_v31, -1.0 }
  0x84   : > { %v473_v35 = vadd.f32 %v472_v58, %v465_v60  ;;  %v480_v1 = vmul.f32 %v479_v28, %v475_v48  ;;  %v483_v2 = vmul.f32 %v482_v59, %v475_v48  ;;  %1088 = vst [vmem:[%s2796_s22 + $0x40] sm:$0xff] %v510_v38  ;;  %v532_v6 = vadd.f32 %v531_v5, %v250_v4 }
  0x85   : > { %1089 = vst [vmem:[%s2796_s22 + $0x50] sm:$0xff] %v513_v0  ;;  %v525_v47 = vsel %vm492_vm0, %v2428_v30, -1.0  ;;  %v3315_v4 = vmov 0.0   ;;  %v3317_v12 = vmov 0.0   ;;  %v3319_v13 = vmov 0.0  }
  0x86   : > { %v481_v32 = vadd.f32 %v480_v1, %v473_v35  ;;  %v488_v7 = vmul.f32 %v487_v20, %v483_v2  ;;  %v491_v8 = vmul.f32 %v490_v41, %v483_v2  ;;  %1090 = vst [vmem:[%s2796_s22 + $0x60] sm:$0xff] %v516_v37  ;;  %v533_v9 = vmul.f32 2.0, %v532_v6 }
  0x87   : > { %1091 = vst [vmem:[%s2796_s22 + $0x70] sm:$0xff] %v519_v36  ;;  %v3321_v30 = vmov 0.0   ;;  %v3323_v14 = vmov 0.0   ;;  %v3325_v45 = vmov 0.0   ;;  %v3327_v46 = vmov 0.0  }
  0x88   : > { %v489_v10 = vadd.f32 %v488_v7, %v481_v32  ;;  %v496_v57 = vmul.f32 %v495_v34, %v491_v8  ;;  %1092 = vst [vmem:[%s2796_s22 + $0x80] sm:$0xff] %v522_v33  ;;  %v534_v11 = vsub.f32 63.0, %v533_v9  ;;  %v3331_v15 = vmov 0.0   ;;  %976 = sbr.rel (%p1095_p2) target bundleno = 201 (0xc9), region = 122 }
  0x89   : > { %1093 = vst [vmem:[%s2796_s22 + $0x90] sm:$0xff] %v525_v47  ;;  %v3333_v56 = vmov 0.0   ;;  %v3335_v16 = vmov inf   ;;  %v3337_v54 = vmov inf   ;;  %v3339_v44 = vmov inf  }
  0x8a   : > { %v497_v31 = vadd.f32 %v496_v57, %v489_v10  ;;  %v3311_v3 = vmul.f32 %v534_v11, %v2788_v17  ;;  %v3329_v17 = vmov 0.0   ;;  %v3341_v24 = vmov inf  }
  0x8b   : > { %v3343_v55 = vmov inf   ;;  %v3345_v25 = vmov inf   ;;  %v3347_v43 = vmov inf   ;;  %v3349_v23 = vmov inf  }
  0x8c   : > { %498 = vst [vmem:[%s2786_s7] sm:$0xff] %v497_v31  ;;  %v3351_v53 = vmov inf   ;;  %v3353_v26 = vmov inf  }
  0x8d   : > { %v3357_v27 = vmov 0.0   ;;  %v3359_v22 = vmov 0.0   ;;  %v3361_v28 = vmov 0.0   ;;  %v3363_v29 = vmov 0.0  }
  0x8e   : > { %v3365_v42 = vmov 0.0   ;;  %v3367_v52 = vmov 0.0   ;;  %v3369_v61 = vmov 0.0   ;;  %v3371_v49 = vmov 0.0  }
  0x8f   : > { %v3373_v21 = vmov 0.0   ;;  %v3375_v59 = vmov 0.0   ;;  %v3377_v20 = vmov inf   ;;  %v3379_v62 = vmov inf  }
  0x90   : > { %v3381_v63 = vmov inf   ;;  %v3383_v39 = vmov inf   ;;  %v3385_v19 = vmov inf   ;;  %v3387_v40 = vmov inf  }
  0x91   : > { %v3389_v41 = vmov inf   ;;  %v3391_v50 = vmov inf   ;;  %v3393_v51 = vmov inf   ;;  %v3395_v38 = vmov inf  }
  0x92 LB: >> { %s1096_s26 = sshll.u32 %s2548_s25, 1  ;;  %s541_s25 = sadd.s32 1, %s2548_s25   ;;  %s2548_s25 = sphi %s3397_s25, %s541_s25   ;;  %v2544_v38 = vphi %v3395_v38, %v3934_v38   ;;  %v2540_v51 = vphi %v3393_v51, %v3933_v51   ;;  %v2536_v50 = vphi %v3391_v50, %v3932_v50   ;;  %v2532_v41 = vphi %v3389_v41, %v3931_v41   ;;  %v2528_v40 = vphi %v3387_v40, %v3930_v40   ;;  %v2524_v19 = vphi %v3385_v19, %v3929_v19   ;;  %v2520_v39 = vphi %v3383_v39, %v3928_v39   ;;  %v2516_v63 = vphi %v3381_v63, %v3927_v63   ;;  %v2512_v62 = vphi %v3379_v62, %v3926_v62   ;;  %v2508_v20 = vphi %v3377_v20, %v3925_v20   ;;  %v2504_v59 = vphi %v3375_v59, %v3924_v59   ;;  %v2500_v21 = vphi %v3373_v21, %v3923_v21   ;;  %v2496_v49 = vphi %v3371_v49, %v3922_v49   ;;  %v2492_v61 = vphi %v3369_v61, %v3921_v61   ;;  %v2488_v52 = vphi %v3367_v52, %v3920_v52   ;;  %v2484_v42 = vphi %v3365_v42, %v3919_v42   ;;  %v2480_v29 = vphi %v3363_v29, %v3918_v29   ;;  %v2476_v28 = vphi %v3361_v28, %v3917_v28   ;;  %v2472_v22 = vphi %v3359_v22, %v3916_v22   ;;  %v2468_v27 = vphi %v3357_v27, %v3915_v27  }
  0x93   : >> { %s565_s27 = sadd.s32 %s1096_s26, %s3237_s18  ;;  %p3598_p3 = scmp.ge.s32.totalorder %s541_s25, %s3240_s23 }
  0x94   : >> { %s566_s10 = sld [smem:[#allocation5 + %s565_s27]]  ;;  %s627_s16 = sadd.s32 1, %s565_s27 }
  0x95   : >> { %s567_s17 = sld [smem:[#allocation8 + %s565_s27]] }
  0x96   : >> { %s568_s19 = sld [smem:[#allocation10 + %s565_s27]] }
  0x97   : >> { %s628_s20 = sld [smem:[#allocation5 + %s627_s16]] }
  0x98   : >> { %s629_s21 = sld [smem:[#allocation8 + %s627_s16]] }
  0x99   : >> { %s630_s15 = sld [smem:[#allocation10 + %s627_s16]] }
  0x9a   : >> { %v569_v60 = vstv %s566_s10 }
  0x9b   : >> { %v570_v58 = vsub.f32 %v2791_v18, %v569_v60  ;;  %v571_v48 = vstv %s567_s17 }
  0x9c   : >> { %v572_v0 = vsub.f32 %v3311_v3, %v571_v48  ;;  %v577_v33 = vstv %s568_s19 }
  0x9d   : >> { %v573_v37 = vmul.f32 %v570_v58, %v570_v58  ;;  %v631_v36 = vstv %s628_s20 }
  0x9e   : >> { %v574_v35 = vmul.f32 %v572_v0, %v572_v0  ;;  %v632_v1 = vsub.f32 %v2791_v18, %v631_v36  ;;  %v633_v2 = vstv %s629_s21 }
  0x9f   : >> { %v634_v5 = vsub.f32 %v3311_v3, %v633_v2  ;;  %v639_v10 = vstv %s630_s15 }
  0xa0   : >> { %v575_v34 = vadd.f32 %v574_v35, %v573_v37  ;;  %v635_v6 = vmul.f32 %v632_v1, %v632_v1 }
  0xa1   : >> { %v636_v32 = vmul.f32 %v634_v5, %v634_v5 }
  0xa2   : >> { %vm576_vm1 = vcmp.lt.f32.partialorder %v575_v34, 2.5e-05 }
  0xa3   : >> { %v578_v7 = vsel %vm576_vm1, %v577_v33, inf  ;;  %v637_v8 = vadd.f32 %v636_v32, %v635_v6 }
  0xa4   : >> { %vm579_vm2 = vcmp.lt.f32.partialorder %v578_v7, %v2544_v38 }
  0xa5   : >> { %v582_v47 = vsel %vm579_vm2, %v2544_v38, %v578_v7  ;;  %v583_v9 = vsel %vm579_vm2, %v2504_v59, %v575_v34  ;;  %vm638_vm4 = vcmp.lt.f32.partialorder %v637_v8, 2.5e-05  ;;  %v580_v57 = vsel %vm579_vm2, %v578_v7, %v2544_v38 }
  0xa6   : >> { %vm584_vm3 = vcmp.lt.f32.partialorder %v582_v47, %v2540_v51  ;;  %v640_v4 = vsel %vm638_vm4, %v639_v10, inf  ;;  %v581_v30 = vsel %vm579_vm2, %v575_v34, %v2504_v59 }
  0xa7   : >> { %v587_v11 = vsel %vm584_vm3, %v2540_v51, %v582_v47  ;;  %v588_v31 = vsel %vm584_vm3, %v2500_v21, %v583_v9  ;;  %vm641_vm7 = vcmp.lt.f32.partialorder %v640_v4, %v580_v57  ;;  %v585_v14 = vsel %vm584_vm3, %v582_v47, %v2540_v51 }
  0xa8   : >> { %vm589_vm5 = vcmp.lt.f32.partialorder %v587_v11, %v2536_v50  ;;  %v3482_v38 = vsel %vm641_vm7, %v640_v4, %v580_v57   ;;  %v3485_v59 = vsel %vm641_vm7, %v637_v8, %v581_v30   ;;  %v644_v17 = vsel %vm641_vm7, %v580_v57, %v640_v4 }
  0xa9   : >> { %v592_v12 = vsel %vm589_vm5, %v2536_v50, %v587_v11  ;;  %v593_v13 = vsel %vm589_vm5, %v2496_v49, %v588_v31  ;;  %v3904_v26 = vmov %v3482_v38  ;;  %v3905_v56 = vmov %v3485_v59 }
  0xaa   : >> { %vm594_vm6 = vcmp.lt.f32.partialorder %v592_v12, %v2532_v41  ;;  %v586_v16 = vsel %vm584_vm3, %v583_v9, %v2500_v21  ;;  %vm646_vm10 = vcmp.lt.f32.partialorder %v644_v17, %v585_v14  ;;  %v590_v54 = vsel %vm589_vm5, %v587_v11, %v2536_v50 }
  0xab   : >> { %v597_v45 = vsel %vm594_vm6, %v2532_v41, %v592_v12  ;;  %v598_v46 = vsel %vm594_vm6, %v2492_v61, %v593_v13  ;;  %v645_v55 = vsel %vm641_vm7, %v581_v30, %v637_v8  ;;  %v3506_v51 = vsel %vm646_vm10, %v644_v17, %v585_v14  }
  0xac   : >> { %vm599_vm8 = vcmp.lt.f32.partialorder %v597_v45, %v2528_v40  ;;  %v3906_v53 = vmov %v3506_v51  ;;  %v3509_v21 = vsel %vm646_vm10, %v645_v55, %v586_v16   ;;  %v649_v43 = vsel %vm646_vm10, %v585_v14, %v644_v17 }
  0xad   : >> { %v602_v15 = vsel %vm599_vm8, %v2528_v40, %v597_v45  ;;  %v603_v44 = vsel %vm599_vm8, %v2488_v52, %v598_v46  ;;  %v3907_v25 = vmov %v3509_v21  ;;  %v591_v59 = vsel %vm589_vm5, %v588_v31, %v2496_v49 }
  0xae   : >> { %vm604_vm9 = vcmp.lt.f32.partialorder %v602_v15, %v2524_v19  ;;  %vm651_vm13 = vcmp.lt.f32.partialorder %v649_v43, %v590_v54  ;;  %v595_v51 = vsel %vm594_vm6, %v592_v12, %v2532_v41  ;;  %v650_v60 = vsel %vm646_vm10, %v586_v16, %v645_v55 }
  0xaf   : >> { %v607_v24 = vsel %vm604_vm9, %v2524_v19, %v602_v15  ;;  %v608_v21 = vsel %vm604_vm9, %v2484_v42, %v603_v44  ;;  %v3529_v50 = vsel %vm651_vm13, %v649_v43, %v590_v54   ;;  %v3531_v49 = vsel %vm651_vm13, %v650_v60, %v591_v59  }
  0xb0   : >> { %vm609_vm11 = vcmp.lt.f32.partialorder %v607_v24, %v2520_v39  ;;  %v3908_v58 = vmov %v3529_v50  ;;  %v3909_v48 = vmov %v3531_v49  ;;  %v654_v0 = vsel %vm651_vm13, %v590_v54, %v649_v43 }
  0xb1   : >> { %v612_v23 = vsel %vm609_vm11, %v2520_v39, %v607_v24  ;;  %v596_v37 = vsel %vm594_vm6, %v593_v13, %v2492_v61  ;;  %v600_v36 = vsel %vm599_vm8, %v597_v45, %v2528_v40  ;;  %v613_v35 = vsel %vm609_vm11, %v2480_v29, %v608_v21 }
  0xb2   : >> { %vm614_vm12 = vcmp.lt.f32.partialorder %v612_v23, %v2516_v63  ;;  %v655_v1 = vsel %vm651_vm13, %v591_v59, %v650_v60  ;;  %vm656_vm15 = vcmp.lt.f32.partialorder %v654_v0, %v595_v51  ;;  %v601_v49 = vsel %vm599_vm8, %v598_v46, %v2488_v52 }
  0xb3   : >> { %v617_v38 = vsel %vm614_vm12, %v2516_v63, %v612_v23  ;;  %v3546_v41 = vsel %vm656_vm15, %v654_v0, %v595_v51   ;;  %v3548_v61 = vsel %vm656_vm15, %v655_v1, %v596_v37   ;;  %v605_v50 = vsel %vm604_vm9, %v602_v15, %v2524_v19 }
  0xb4   : >> { %vm619_vm14 = vcmp.lt.f32.partialorder %v617_v38, %v2512_v62  ;;  %v3910_v2 = vmov %v3546_v41  ;;  %v3911_v5 = vmov %v3548_v61  ;;  %v659_v33 = vsel %vm656_vm15, %v595_v51, %v654_v0 }
  0xb5   : >> { %v622_v34 = vsel %vm619_vm14, %v2512_v62, %v617_v38  ;;  %v660_v6 = vsel %vm656_vm15, %v596_v37, %v655_v1  ;;  %v606_v32 = vsel %vm604_vm9, %v603_v44, %v2484_v42  ;;  %v610_v52 = vsel %vm609_vm11, %v607_v24, %v2520_v39 }
  0xb6   : >> { %v618_v61 = vsel %vm614_vm12, %v2476_v28, %v613_v35  ;;  %vm661_vm0 = vcmp.lt.f32.partialorder %v659_v33, %v600_v36  ;;  %v611_v19 = vsel %vm609_vm11, %v608_v21, %v2480_v29  ;;  %v615_v42 = vsel %vm614_vm12, %v612_v23, %v2516_v63 }
  0xb7   : >> { %v3565_v40 = vsel %vm661_vm0, %v659_v33, %v600_v36   ;;  %v3567_v41 = vsel %vm661_vm0, %v660_v6, %v601_v49   ;;  %v664_v47 = vsel %vm661_vm0, %v600_v36, %v659_v33  ;;  %v665_v9 = vsel %vm661_vm0, %v601_v49, %v660_v6 }
  0xb8   : >> { %v3912_v7 = vmov %v3565_v40  ;;  %v3913_v8 = vmov %v3567_v41  ;;  %vm624_vm1 = vcmp.lt.f32.partialorder %v622_v34, %v2508_v20  ;;  %vm666_vm2 = vcmp.lt.f32.partialorder %v664_v47, %v605_v50 }
  0xb9   : >> { %v3576_v10 = vsel %vm666_vm2, %v664_v47, %v605_v50   ;;  %v668_v57 = vsel %vm666_vm2, %v665_v9, %v606_v32   ;;  %v669_v11 = vsel %vm666_vm2, %v605_v50, %v664_v47  ;;  %v670_v40 = vsel %vm666_vm2, %v606_v32, %v665_v9 }
  0xba   : >> { %v616_v31 = vsel %vm614_vm12, %v613_v35, %v2476_v28  ;;  %v620_v29 = vsel %vm619_vm14, %v617_v38, %v2512_v62  ;;  %v623_v39 = vsel %vm619_vm14, %v2472_v22, %v618_v61  ;;  %vm671_vm3 = vcmp.lt.f32.partialorder %v669_v11, %v610_v52 }
  0xbb   : >> { %v672_v24 = vsel %vm671_vm3, %v669_v11, %v610_v52   ;;  %v673_v30 = vsel %vm671_vm3, %v670_v40, %v611_v19   ;;  %v674_v4 = vsel %vm671_vm3, %v610_v52, %v669_v11  ;;  %v675_v12 = vsel %vm671_vm3, %v611_v19, %v670_v40 }
  0xbc   : >> { %v621_v13 = vsel %vm619_vm14, %v618_v61, %v2472_v22  ;;  %v625_v28 = vsel %vm624_vm1, %v622_v34, %v2508_v20  ;;  %vm676_vm4 = vcmp.lt.f32.partialorder %v674_v4, %v615_v42  ;;  %v626_v46 = vsel %vm624_vm1, %v623_v39, %v2468_v27 }
  0xbd   : >> { %v677_v44 = vsel %vm676_vm4, %v674_v4, %v615_v42   ;;  %v678_v14 = vsel %vm676_vm4, %v675_v12, %v616_v31   ;;  %v679_v63 = vsel %vm676_vm4, %v615_v42, %v674_v4  ;;  %v680_v45 = vsel %vm676_vm4, %v616_v31, %v675_v12 }
  0xbe   : >> { %vm681_vm5 = vcmp.lt.f32.partialorder %v679_v63, %v620_v29  ;;  %v3919_v42 = vmov %v668_v57  ;;  %v3920_v52 = vmov %v3913_v8  ;;  %v3921_v61 = vmov %v3911_v5 }
  0xbf   : >> { %v682_v54 = vsel %vm681_vm5, %v679_v63, %v620_v29   ;;  %v683_v17 = vsel %vm681_vm5, %v680_v45, %v621_v13   ;;  %v684_v15 = vsel %vm681_vm5, %v620_v29, %v679_v63  ;;  %v685_v16 = vsel %vm681_vm5, %v621_v13, %v680_v45 }
  0xc0   : >> { %vm686_vm6 = vcmp.lt.f32.partialorder %v684_v15, %v625_v28  ;;  %v3916_v22 = vmov %v683_v17  ;;  %v3918_v29 = vmov %v673_v30  ;;  %v3922_v49 = vmov %v3909_v48  ;;  %543 = sbr.rel (!%p3598_p3) target bundleno = 146 (0x92), region = 128 }
  0xc1   : >> { %v687_v55 = vsel %vm686_vm6, %v684_v15, %v625_v28   ;;  %v688_v43 = vsel %vm686_vm6, %v685_v16, %v626_v46   ;;  %v3917_v28 = vmov %v678_v14  ;;  %v3923_v21 = vmov %v3907_v25 }
  0xc2   : >> { %v3915_v27 = vmov %v688_v43  ;;  %v3924_v59 = vmov %v3905_v56  ;;  %v3925_v20 = vmov %v687_v55  ;;  %v3926_v62 = vmov %v682_v54 }
  0xc3   : >> { %v3927_v63 = vmov %v677_v44  ;;  %v3928_v39 = vmov %v672_v24  ;;  %v3929_v19 = vmov %v3576_v10  ;;  %v3930_v40 = vmov %v3912_v7 }
  0xc4   : >> { %v3931_v41 = vmov %v3910_v2  ;;  %v3932_v50 = vmov %v3908_v58  ;;  %v3933_v51 = vmov %v3906_v53  ;;  %v3934_v38 = vmov %v3904_v26 }
  0xc5   : > { %v3935_v4 = vmov %v688_v43  ;;  %v3936_v12 = vmov %v683_v17  ;;  %v3937_v13 = vmov %v678_v14  ;;  %v3938_v14 = vmov %v668_v57 }
  0xc6   : > { %v3939_v45 = vmov %v3913_v8  ;;  %v3940_v46 = vmov %v3911_v5  ;;  %v3941_v17 = vmov %v3909_v48  ;;  %v3942_v15 = vmov %v3907_v25 }
  0xc7   : > { %v3943_v16 = vmov %v687_v55  ;;  %v3944_v55 = vmov %v3576_v10  ;;  %v3945_v25 = vmov %v3912_v7  ;;  %v3946_v43 = vmov %v3910_v2 }
  0xc8   : > { %v3947_v23 = vmov %v3908_v58 }
  0xc9 PF: > { %vm689_vm7 = vcmp.lt.f32.partialorder %v2628_v26, inf  ;;  %v690_v18 = vmul.f32 40000.0, %v2588_v56  ;;  %v696_v3 = vmul.f32 40000.0, %v2584_v15  ;;  %vm695_vm8 = vcmp.lt.f32.partialorder %v2624_v53, inf  ;;  %s792_s18 = scalar_lea.sflag [#allocation6], %s235_s28  ;;  %v2628_v26 = vphi %v3353_v26, %v3904_v26   ;;  %v2624_v53 = vphi %v3351_v53, %v3906_v53   ;;  %v2620_v23 = vphi %v3349_v23, %v3947_v23   ;;  %v2616_v43 = vphi %v3347_v43, %v3946_v43   ;;  %v2612_v25 = vphi %v3345_v25, %v3945_v25   ;;  %v2608_v55 = vphi %v3343_v55, %v3944_v55   ;;  %v2604_v24 = vphi %v3341_v24, %v672_v24   ;;  %v2600_v44 = vphi %v3339_v44, %v677_v44   ;;  %v2596_v54 = vphi %v3337_v54, %v682_v54   ;;  %v2592_v16 = vphi %v3335_v16, %v3943_v16   ;;  %v2588_v56 = vphi %v3333_v56, %v3905_v56   ;;  %v2584_v15 = vphi %v3331_v15, %v3942_v15   ;;  %v2580_v17 = vphi %v3329_v17, %v3941_v17   ;;  %v2576_v46 = vphi %v3327_v46, %v3940_v46   ;;  %v2572_v45 = vphi %v3325_v45, %v3939_v45   ;;  %v2568_v14 = vphi %v3323_v14, %v3938_v14   ;;  %v2564_v30 = vphi %v3321_v30, %v673_v30   ;;  %v2560_v13 = vphi %v3319_v13, %v3937_v13   ;;  %v2556_v12 = vphi %v3317_v12, %v3936_v12   ;;  %v2552_v4 = vphi %v3315_v4, %v3935_v4  }
  0xca   : > { %vm703_vm9 = vcmp.lt.f32.partialorder %v2620_v23, inf  ;;  %v704_v27 = vmul.f32 40000.0, %v2580_v17  ;;  %v712_v22 = vmul.f32 40000.0, %v2576_v46  ;;  %vm711_vm10 = vcmp.lt.f32.partialorder %v2616_v43, inf }
  0xcb   : > { %v691_v20 = vsub.f32 1.0, %v690_v18  ;;  %v697_v62 = vsub.f32 1.0, %v696_v3  ;;  %v720_v59 = vmul.f32 40000.0, %v2572_v45  ;;  %vm719_vm11 = vcmp.lt.f32.partialorder %v2612_v25, inf }
  0xcc   : > { %v705_v51 = vsub.f32 1.0, %v704_v27  ;;  %v713_v21 = vsub.f32 1.0, %v712_v22  ;;  %v728_v38 = vmul.f32 40000.0, %v2568_v14  ;;  %vm727_vm12 = vcmp.lt.f32.partialorder %v2608_v55, inf }
  0xcd   : > { %v692_v60 = vsel %vm689_vm7, %v691_v20, 0.0  ;;  %v698_v56 = vsel %vm695_vm8, %v697_v62, 0.0  ;;  %v721_v58 = vsub.f32 1.0, %v720_v59  ;;  %vm735_vm13 = vcmp.lt.f32.partialorder %v2604_v24, inf }
  0xce   : > { %v694_v48 = vsub.f32 1.0, %v692_v60  ;;  %v701_v0 = vsub.f32 1.0, %v698_v56  ;;  %v706_v37 = vsel %vm703_vm9, %v705_v51, 0.0  ;;  %v714_v36 = vsel %vm711_vm10, %v713_v21, 0.0 }
  0xcf   : > { %v709_v35 = vsub.f32 1.0, %v706_v37  ;;  %v722_v1 = vsel %vm719_vm11, %v721_v58, 0.0  ;;  %v729_v49 = vsub.f32 1.0, %v728_v38  ;;  %v717_v50 = vsub.f32 1.0, %v714_v36 }
  0xd0   : > { %v699_v2 = vmul.f32 %v698_v56, %v694_v48  ;;  %v702_v5 = vmul.f32 %v701_v0, %v694_v48  ;;  %v736_v34 = vmul.f32 40000.0, %v2564_v30  ;;  %v725_v33 = vsub.f32 1.0, %v722_v1 }
  0xd1   : > { %v730_v6 = vsel %vm727_vm12, %v729_v49, 0.0  ;;  %vm743_vm14 = vcmp.lt.f32.partialorder %v2600_v44, inf  ;;  %v744_v32 = vmul.f32 40000.0, %v2560_v13  ;;  %vm751_vm15 = vcmp.lt.f32.partialorder %v2596_v54, inf }
  0xd2   : > { %v700_v52 = vadd.f32 %v699_v2, %v692_v60  ;;  %v707_v61 = vmul.f32 %v706_v37, %v702_v5  ;;  %v710_v7 = vmul.f32 %v709_v35, %v702_v5  ;;  %v733_v41 = vsub.f32 1.0, %v730_v6 }
  0xd3   : > { %v737_v8 = vsub.f32 1.0, %v736_v34  ;;  %v745_v47 = vsub.f32 1.0, %v744_v32  ;;  %v752_v9 = vmul.f32 40000.0, %v2556_v12  ;;  %v760_v57 = vmul.f32 40000.0, %v2552_v4 }
  0xd4   : > { %v708_v19 = vadd.f32 %v707_v61, %v700_v52  ;;  %v715_v42 = vmul.f32 %v714_v36, %v710_v7  ;;  %v718_v10 = vmul.f32 %v717_v50, %v710_v7  ;;  %v766_v29 = vsel %vm689_vm7, %v2628_v26, -1.0 }
  0xd5   : > { %v738_v11 = vsel %vm735_vm13, %v737_v8, 0.0  ;;  %v746_v40 = vsel %vm743_vm14, %v745_v47, 0.0  ;;  %v753_v31 = vsub.f32 1.0, %v752_v9  ;;  %767 = vst [vmem:[%s2796_s22 + $0x8] sm:$0xff] %v766_v29  ;;  %vm759_vm0 = vcmp.lt.f32.partialorder %v2592_v16, inf }
  0xd6   : > { %v716_v39 = vadd.f32 %v715_v42, %v708_v19  ;;  %v723_v30 = vmul.f32 %v722_v1, %v718_v10  ;;  %v726_v13 = vmul.f32 %v725_v33, %v718_v10  ;;  %v741_v28 = vsub.f32 1.0, %v738_v11 }
  0xd7   : > { %v749_v12 = vsub.f32 1.0, %v746_v40  ;;  %v754_v4 = vsel %vm751_vm15, %v753_v31, 0.0  ;;  %v768_v14 = vsel %vm695_vm8, %v2624_v53, -1.0  ;;  %v761_v17 = vsub.f32 1.0, %v760_v57 }
  0xd8   : > { %v724_v63 = vadd.f32 %v723_v30, %v716_v39  ;;  %v731_v45 = vmul.f32 %v730_v6, %v726_v13  ;;  %v734_v46 = vmul.f32 %v733_v41, %v726_v13  ;;  %1097 = vst [vmem:[%s2796_s22 + $0x18] sm:$0xff] %v768_v14  ;;  %v757_v26 = vsub.f32 1.0, %v754_v4 }
  0xd9   : > { %v770_v15 = vsel %vm703_vm9, %v2620_v23, -1.0  ;;  %v772_v18 = vsel %vm711_vm10, %v2616_v43, -1.0  ;;  %v774_v53 = vsel %vm719_vm11, %v2612_v25, -1.0  ;;  %v776_v20 = vsel %vm727_vm12, %v2608_v55, -1.0 }
  0xda   : > { %v732_v3 = vadd.f32 %v731_v45, %v724_v63  ;;  %v739_v27 = vmul.f32 %v738_v11, %v734_v46  ;;  %v742_v22 = vmul.f32 %v741_v28, %v734_v46  ;;  %1098 = vst [vmem:[%s2796_s22 + $0x28] sm:$0xff] %v770_v15  ;;  %v778_v23 = vsel %vm735_vm13, %v2604_v24, -1.0 }
  0xdb   : > { %1099 = vst [vmem:[%s2796_s22 + $0x38] sm:$0xff] %v772_v18  ;;  %v780_v59 = vsel %vm743_vm14, %v2600_v44, -1.0  ;;  %v762_v55 = vsel %vm759_vm0, %v761_v17, 0.0  ;;  %v782_v24 = vsel %vm751_vm15, %v2596_v54, -1.0  ;;  %v784_v60 = vsel %vm759_vm0, %v2592_v16, -1.0 }
  0xdc   : > { %v740_v43 = vadd.f32 %v739_v27, %v732_v3  ;;  %v747_v62 = vmul.f32 %v746_v40, %v742_v22  ;;  %v750_v25 = vmul.f32 %v749_v12, %v742_v22  ;;  %1100 = vst [vmem:[%s2796_s22 + $0x48] sm:$0xff] %v774_v53 }
  0xdd   : > { %1101 = vst [vmem:[%s2796_s22 + $0x58] sm:$0xff] %v776_v20 }
  0xde   : > { %v748_v51 = vadd.f32 %v747_v62, %v740_v43  ;;  %v755_v21 = vmul.f32 %v754_v4, %v750_v25  ;;  %v758_v38 = vmul.f32 %v757_v26, %v750_v25  ;;  %1102 = vst [vmem:[%s2796_s22 + $0x68] sm:$0xff] %v778_v23 }
  0xdf   : > { %1103 = vst [vmem:[%s2796_s22 + $0x78] sm:$0xff] %v780_v59 }
  0xe0   : > { %v756_v56 = vadd.f32 %v755_v21, %v748_v51  ;;  %v763_v44 = vmul.f32 %v762_v55, %v758_v38  ;;  %1104 = vst [vmem:[%s2796_s22 + $0x88] sm:$0xff] %v782_v24 }
  0xe1   : > { %1105 = vst [vmem:[%s2796_s22 + $0x98] sm:$0xff] %v784_v60 }
  0xe2   : > { %v764_v58 = vadd.f32 %v763_v44, %v756_v56 }
  0xe4   : > { %765 = vst [vmem:[%s2786_s7 + $0x8] sm:$0xff] %v764_v58 }
  0xe5   : > { %s807_s25 = scalar_lea.hbm %s3853_s6, %s2770_s11  ;;  %s818_s26 = sshll.u32 %s2796_s22, 4  ;;  %s819_s26 = int_to_ptr.vmem [resolvable:$true] %s818_s26 }
  0xe6   : > { %s820_s27 = sshll.u32 %s807_s25, 4  ;;  %s2636_s7 = smov 256   ;;  %s821_s27 = int_to_ptr.hbm [resolvable:$true] %s820_s27 }
  0xe7   : > { %1127 = sst [smem:[#allocation13]] (%p2722_p5), %s2636_s7  ;;  %s2637_s28 = smov 1024  }
  0xe8   : > { %1128 = sst [smem:[#allocation13 + $0x1]] (%p2722_p5), %s2637_s28  ;;  %s2638_s10 = smov 2  }
  0xe9   : > { %1129 = sst [smem:[#allocation13 + $0x2]] (%p2722_p5), %s2638_s10  ;;  %s2639_s16 = smov 128  }
  0xea   : > { %1130 = sst [smem:[#allocation13 + $0x3]] (%p2722_p5), %s2639_s16  ;;  %s2640_s11 = smov 8  }
  0xeb   : > { %1131 = sst [smem:[#allocation13 + $0x4]] (%p2722_p5), %s2639_s16  ;;  %s2641_s22 = smov [#allocation12]  }
  0xec   : > { %1132 = sst [smem:[#allocation13 + $0x5]] (%p2722_p5), %s2640_s11  ;;  %s2642_s17 = smov 0  }
  0xed   : > { %1133 = dma.general (%p2722_p5), %s819_s26, 2560, %s821_s27, %s792_s18, %s2641_s22, [#allocation13], %s2642_s17, 0  }
  0xee PF: > { %p1155_p4 = scmp.ge.s32.totalorder %s2300_s1, 2  ;;  %s856_s19 = sand.u32 1, %s2288_s29  }
  0xef   : > { %s857_s20 = scalar_lea.sflag [#allocation6], %s856_s19 }
  0xf0   : > { %p1146_p7 = pnand %p1155_p4, %p2726_p6 }
  0xf2   : > { %p1147_p8 = pneg %p1146_p7 }
  0xf4   : > { %2283 = dma.done.wait (%p1147_p8), %s857_s20, 2560  }
  0xf5   : > { %2285 = vsyncadd (%p1147_p8), %s857_s20, 4294964736  ;;  %p32_p9 = scmp.ge.s32.totalorder %s2709_s9, 6   ;;  %s3948_s29 = smov %s2292_s0 }
  0xf6   : > { %s3949_s0 = smov %s2296_s30  ;;  %s3950_s30 = smov %s2720_s12 }
  0xf7   : > { %s3951_s1 = smov %s2709_s9  ;;  %34 = sbr.rel (!%p32_p9) target bundleno = 12 (0xc), region = 139 }
  0xfc   :  { %863 = vsyncpa [#allocation6], 1 }
  0xfd   :  { %865 = vsyncpa [#allocation6 + $0x1], 1 }
  0xfe   :  { %866 = vsyncpa [#allocation7], 1 }
  0xff   :  { %868 = vsyncpa [#allocation7 + $0x1], 1 }
 0x100   :  { %869 = vsyncpa [#allocation9], 1 }

</bundles_post_ra>
